<compile_context>
chip_gen: v7x
topology: tpu7x:2x2x1
jax: 0.10.0
libtpu: 0.0.40
codegen_flags: <defaults>
</compile_context>

<pallas_src>
import math

import jax
import jax.numpy as jnp
from jax.experimental import pallas as pl
from jax.experimental.pallas import tpu as pltpu

IN_FEATURES = 50 * 52                           # 2600
LAYER_DIMS = [(IN_FEATURES, 128), (128, 128), (128, 64), (64, 1)]

UCB_K = 0.5                                     # BaGTI exploration coefficient (fixed)

_RELU_SCALE = math.sqrt(8.0 / math.pi)          # sigmoid(scale*x) ~ Phi(x)
_INV_SQRT_2PI = 1.0 / math.sqrt(2.0 * math.pi)
_XI_SQ = math.pi / 8.0
_ALPHA = 4.0 - 2.0 * math.sqrt(2.0)
_BETA = -math.log(math.sqrt(2.0) + 1.0)
_VAR_EPS = 1e-12                                # guards rsqrt against tiny negative a_s


# ----------------------------- shared NPN math ------------------------------

def _softplus(x):
    # numerically stable log(1 + exp(x)); host-side only (hoisted out of kernel)
    return jnp.logaddexp(jnp.asarray(x, jnp.float32), 0.0)


def _mxu_dot(a, b):
    """bf16 x bf16 -> f32-accumulated MXU matmul (same rounding in kernel & ref)."""
    return jnp.dot(a.astype(jnp.bfloat16), b.astype(jnp.bfloat16),
                   preferred_element_type=jnp.float32)


def _npn_relu(o_m, o_s):
    # The original PyTorch module can NaN when the previous layer's variance
    # cancels to a tiny negative value; the clamp only guards that hazard.
    o_s = jnp.maximum(o_s, _VAR_EPS)
    inv_std = jax.lax.rsqrt(o_s)                # EUP
    std = o_s * inv_std                         # sqrt(o_s)
    z = o_m * inv_std
    cdf = jax.nn.sigmoid(_RELU_SCALE * z)
    pdf = _INV_SQRT_2PI * jnp.exp(-0.5 * z * z)
    a_m = cdf * o_m + std * pdf
    a_s = cdf * (o_m * o_m + o_s) + o_m * std * pdf - a_m * a_m
    return a_m, a_s


def _npn_sigmoid(o_m, o_s):
    o_s = jnp.maximum(o_s, 0.0)
    a_m = jax.nn.sigmoid(o_m * jax.lax.rsqrt(1.0 + _XI_SQ * o_s))
    a_s = (jax.nn.sigmoid(_ALPHA * (o_m + _BETA)
                          * jax.lax.rsqrt(1.0 + _XI_SQ * _ALPHA * _ALPHA * o_s))
           - a_m * a_m)
    return a_m, a_s


def _fused_linear(a_m, a_s, rhs, b_m, b_s, out_dim):
    """Fused dual-input NPNLinear: one (TB, 3*in) @ (3*in, 2*out) MXU matmul.
    rhs is the precomputed block matrix [[Wm, 0], [0, Ws+Wm^2], [0, Ws]]."""
    am_b = a_m.astype(jnp.bfloat16)
    as_b = a_s.astype(jnp.bfloat16)
    lhs = jnp.concatenate([am_b, as_b, am_b * am_b], axis=1)
    o = jnp.dot(lhs, rhs, preferred_element_type=jnp.float32)
    return o[:, :out_dim] + b_m, o[:, out_dim:] + b_s


# --------------------------------- kernel -----------------------------------

def _npn_mlp_kernel(x_ref,
                    w1m_ref, v1_ref, b1m_ref, b1s_ref,
                    r2_ref, b2m_ref, b2s_ref,
                    r3_ref, b3m_ref, b3s_ref,
                    w4m_ref, v4_ref, s4_ref, b4m_ref, b4s_ref,
                    out_ref):
    x = x_ref[...]                               # (TB, 2600) bf16
    x_sq = x * x                                 # bf16

    # Layer 1: NPNLinear(2600 -> 128, dual_input=False) + NPNRelu.
    # dual_input=False => x_s = x*x, so the variance matmul collapses to
    #   x^2 @ (2*softplus(W1s) + W1m^2)   -- precomputed as v1 (bf16).
    o_m = jnp.dot(x, w1m_ref[...], preferred_element_type=jnp.float32) + b1m_ref[...]
    o_s = jnp.dot(x_sq, v1_ref[...], preferred_element_type=jnp.float32) + b1s_ref[...]
    a_m, a_s = _npn_relu(o_m, o_s)

    # Layer 2: NPNLinear(128 -> 128) + NPNRelu (fused K=384, N=256 matmul).
    o_m, o_s = _fused_linear(a_m, a_s, r2_ref[...], b2m_ref[...], b2s_ref[...], 128)
    a_m, a_s = _npn_relu(o_m, o_s)

    # Layer 3: NPNLinear(128 -> 64) + NPNRelu (fused K=384, N=128 matmul).
    o_m, o_s = _fused_linear(a_m, a_s, r3_ref[...], b3m_ref[...], b3s_ref[...], 64)
    a_m, a_s = _npn_relu(o_m, o_s)

    # Layer 4: NPNLinear(64 -> 1) + NPNSigmoid (tiny; separate dots).
    am_b = a_m.astype(jnp.bfloat16)
    as_b = a_s.astype(jnp.bfloat16)
    o_m = jnp.dot(am_b, w4m_ref[...], preferred_element_type=jnp.float32) + b4m_ref[...]
    o_s = (jnp.dot(as_b, v4_ref[...], preferred_element_type=jnp.float32)
           + jnp.dot(am_b * am_b, s4_ref[...], preferred_element_type=jnp.float32)
           + b4s_ref[...])
    y_m, y_s = _npn_sigmoid(o_m, o_s)

    # Inference branch of forward(): UCB score.
    out_ref[...] = y_m + UCB_K * y_s


# ------------------------- parameter preparation ----------------------------

def prepare_params(params):
    """Hoist all weight-side transforms out of the kernel (do this ONCE):
    softplus(W_s), softplus(b_s), the combined layer-1 variance matrix and the
    block-structured fused RHS for the hidden layers.  MXU operands -> bf16."""
    (w1m, w1s, b1m, b1s), l2, l3, (w4m, w4s, b4m, b4s) = params
    f32, bf16 = jnp.float32, jnp.bfloat16

    def fused_rhs(wm, ws_raw):
        wm = jnp.asarray(wm, f32)
        ws = _softplus(ws_raw)
        fin, fout = wm.shape
        z = jnp.zeros((fin, fout), f32)
        top = jnp.concatenate([wm, z], axis=1)              # a_m   path -> o_m
        mid = jnp.concatenate([z, ws + wm * wm], axis=1)    # a_s   path -> o_s
        bot = jnp.concatenate([z, ws], axis=1)              # a_m^2 path -> o_s
        return jnp.concatenate([top, mid, bot], axis=0).astype(bf16)

    w1m = jnp.asarray(w1m, f32)
    v1 = 2.0 * _softplus(w1s) + w1m * w1m
    w4m = jnp.asarray(w4m, f32)
    w4s_sp = _softplus(w4s)

    return [
        w1m.astype(bf16), v1.astype(bf16),
        jnp.asarray(b1m, f32), _softplus(b1s),
        fused_rhs(*l2[:2]), jnp.asarray(l2[2], f32), _softplus(l2[3]),
        fused_rhs(*l3[:2]), jnp.asarray(l3[2], f32), _softplus(l3[3]),
        w4m.astype(bf16), (w4s_sp + w4m * w4m).astype(bf16), w4s_sp.astype(bf16),
        jnp.asarray(b4m, f32), _softplus(b4s),
    ]


# -------------------------------- wrapper ------------------------------------

_SUB = 16          # sublane granularity for bf16 activations
_MAX_TILE_B = 512  # fills MXU M dim; bf16 x double buffer ~5.3 MiB (v7x-safe)


def _round_up(n, m):
    return ((n + m - 1) // m) * m


def _choose_tiling(b):
    b_aligned = _round_up(b, _SUB)
    if b_aligned <= _SUB:
        n_tiles = 1        # tiny batch: splitting only duplicates the weight fetch
    else:
        # >= 2 tiles so the "parallel" grid engages both v7x TensorCores.
        n_tiles = max(2, pl.cdiv(b_aligned, _MAX_TILE_B))
    tile_b = _round_up(pl.cdiv(b_aligned, n_tiles), _SUB)
    return tile_b, n_tiles


def _forward(x, prepared_params):
    x = jnp.asarray(x).reshape(-1, IN_FEATURES).astype(jnp.bfloat16)
    b = x.shape[0]
    tile_b, n_tiles = _choose_tiling(b)
    b_pad = tile_b * n_tiles
    if b_pad != b:          # at most ~16 rows per tile; never a full extra copy
        x = jnp.pad(x, ((0, b_pad - b), (0, 0)))

    def full_spec(a):       # whole-array, grid-invariant block (fetched once)
        return pl.BlockSpec(a.shape, lambda i: (0, 0))

    out = pl.pallas_call(
        _npn_mlp_kernel,
        out_shape=jax.ShapeDtypeStruct((b_pad, 1), jnp.float32),
        grid=(n_tiles,),
        in_specs=[pl.BlockSpec((tile_b, IN_FEATURES), lambda i: (i, 0))]
                 + [full_spec(a) for a in prepared_params],
        out_specs=pl.BlockSpec((tile_b, 1), lambda i: (i, 0)),
        compiler_params=pltpu.CompilerParams(
            dimension_semantics=("parallel",),
            vmem_limit_bytes=32 * 1024 * 1024),
    )(x, *prepared_params)
    return out[:b]


stochastic_energy_latency_50_forward = jax.jit(_forward)


# ---------------------------- params & reference -----------------------------

def init_params(key):
    """Deterministic raw NPN parameters: per layer (W_m, W_s_raw, b_m, b_s_raw).
    Weights are stored (in_features, out_features) = transpose of nn.Linear."""
    params = []
    for i, (fin, fout) in enumerate(LAYER_DIMS):
        kwm, kws, kbm, kbs = jax.random.split(jax.random.fold_in(key, i), 4)
        bound = math.sqrt(6.0) / math.sqrt(fin + fout)
        w_m = jax.random.uniform(kwm, (fin, fout), jnp.float32, -bound, bound)
        w_s_raw = jax.random.uniform(kws, (fin, fout), jnp.float32, -5.0, -3.0)
        b_m = jax.random.uniform(kbm, (1, fout), jnp.float32, -0.1, 0.1)
        b_s_raw = jax.random.uniform(kbs, (1, fout), jnp.float32, -5.0, -3.0)
        params.append((w_m, w_s_raw, b_m, b_s_raw))
    return params


def reference_forward(x, params):
    """Pure-JAX NPN reference from the RAW parameters (PyTorch-style expressions;
    same bf16 operand rounding / grouping as the kernel so both sides agree)."""
    x_m = jnp.asarray(x, jnp.float32).reshape(-1, IN_FEATURES).astype(jnp.bfloat16)
    x_s = x_m * x_m                              # first NPNLinear: dual_input=False
    for li, (w_m, w_s_raw, b_m, b_s_raw) in enumerate(params):
        w_m = jnp.asarray(w_m, jnp.float32)
        w_s = _softplus(w_s_raw)
        b_s = _softplus(b_s_raw)
        o_m = _mxu_dot(x_m, w_m) + b_m
        if li == 0:                              # x_s == x_m*x_m here
            o_s = _mxu_dot(x_s, 2.0 * w_s + w_m * w_m) + b_s
        else:
            o_s = (_mxu_dot(x_s, w_s + w_m * w_m)
                   + _mxu_dot(x_m * x_m, w_s) + b_s)
        if li < len(params) - 1:                 # NPNRelu
            a_m, a_s = _npn_relu(o_m, o_s)
            x_m, x_s = a_m.astype(jnp.bfloat16), a_s.astype(jnp.bfloat16)
        else:                                    # NPNSigmoid
            x_m, x_s = _npn_sigmoid(o_m, o_s)
    return x_m + UCB_K * x_s


# ----------------------------------- main ------------------------------------

if __name__ == "__main__":
    key = jax.random.PRNGKey(0)
    k_x, k_p = jax.random.split(key)

    # Batch of B candidate (50, 52) scheduling matrices (the PyTorch module
    # flattens each to (1, 2600); batching amortizes the weight DMA).
    B = 8
    x = jax.random.uniform(k_x, (B, 50, 52), jnp.float32)
    params = init_params(k_p)
    prepared = prepare_params(params)            # hoisted weight transforms (once)

    out = stochastic_energy_latency_50_forward(x, prepared)
    out = jax.block_until_ready(out)

    expected = reference_forward(x, params)
    assert out.shape == (B, 1), out.shape
    assert bool(jnp.all(jnp.isfinite(out))), out
    assert jnp.allclose(out, expected, rtol=2e-3, atol=2e-3), (out, expected)

    print("KERNEL_OK")
</pallas_src>

<mosaic_0001>
module attributes {stable_mosaic.version = 11 : i64} {
  func.func @_npn_mlp_kernel(%arg0: i32, %arg1: memref<16x2600xbf16, #tpu.memory_space<vmem>>, %arg2: memref<2600x128xbf16, #tpu.memory_space<vmem>>, %arg3: memref<2600x128xbf16, #tpu.memory_space<vmem>>, %arg4: memref<1x128xf32, #tpu.memory_space<vmem>>, %arg5: memref<1x128xf32, #tpu.memory_space<vmem>>, %arg6: memref<384x256xbf16, #tpu.memory_space<vmem>>, %arg7: memref<1x128xf32, #tpu.memory_space<vmem>>, %arg8: memref<1x128xf32, #tpu.memory_space<vmem>>, %arg9: memref<384x128xbf16, #tpu.memory_space<vmem>>, %arg10: memref<1x64xf32, #tpu.memory_space<vmem>>, %arg11: memref<1x64xf32, #tpu.memory_space<vmem>>, %arg12: memref<64x1xbf16, #tpu.memory_space<vmem>>, %arg13: memref<64x1xbf16, #tpu.memory_space<vmem>>, %arg14: memref<64x1xbf16, #tpu.memory_space<vmem>>, %arg15: memref<1x1xf32, #tpu.memory_space<vmem>>, %arg16: memref<1x1xf32, #tpu.memory_space<vmem>>, %arg17: memref<16x1xf32, #tpu.memory_space<vmem>>) attributes {dimension_semantics = [#tpu.dimension_semantics<parallel>], iteration_bounds = array<i64: 1>, scalar_prefetch = 0 : i64, scratch_operands = 0 : i64, tpu.core_type = #tpu.core_type<tc>, window_params = [{transform_indices = @transform_0, window_bounds = array<i64: 16, 2600>}, {pipeline_mode = #tpu.pipeline_mode<synchronous>, transform_indices = @transform_1, window_bounds = array<i64: 2600, 128>}, {pipeline_mode = #tpu.pipeline_mode<synchronous>, transform_indices = @transform_2, window_bounds = array<i64: 2600, 128>}, {pipeline_mode = #tpu.pipeline_mode<synchronous>, transform_indices = @transform_3, window_bounds = array<i64: 1, 128>}, {pipeline_mode = #tpu.pipeline_mode<synchronous>, transform_indices = @transform_4, window_bounds = array<i64: 1, 128>}, {pipeline_mode = #tpu.pipeline_mode<synchronous>, transform_indices = @transform_5, window_bounds = array<i64: 384, 256>}, {pipeline_mode = #tpu.pipeline_mode<synchronous>, transform_indices = @transform_6, window_bounds = array<i64: 1, 128>}, {pipeline_mode = #tpu.pipeline_mode<synchronous>, transform_indices = @transform_7, window_bounds = array<i64: 1, 128>}, {pipeline_mode = #tpu.pipeline_mode<synchronous>, transform_indices = @transform_8, window_bounds = array<i64: 384, 128>}, {pipeline_mode = #tpu.pipeline_mode<synchronous>, transform_indices = @transform_9, window_bounds = array<i64: 1, 64>}, {pipeline_mode = #tpu.pipeline_mode<synchronous>, transform_indices = @transform_10, window_bounds = array<i64: 1, 64>}, {pipeline_mode = #tpu.pipeline_mode<synchronous>, transform_indices = @transform_11, window_bounds = array<i64: 64, 1>}, {pipeline_mode = #tpu.pipeline_mode<synchronous>, transform_indices = @transform_12, window_bounds = array<i64: 64, 1>}, {pipeline_mode = #tpu.pipeline_mode<synchronous>, transform_indices = @transform_13, window_bounds = array<i64: 64, 1>}, {pipeline_mode = #tpu.pipeline_mode<synchronous>, transform_indices = @transform_14, window_bounds = array<i64: 1, 1>}, {pipeline_mode = #tpu.pipeline_mode<synchronous>, transform_indices = @transform_15, window_bounds = array<i64: 1, 1>}, {transform_indices = @transform_16, window_bounds = array<i64: 16, 1>}]} {
    %c0 = arith.constant 0 : index
    %c0_0 = arith.constant 0 : index
    %0 = vector.load %arg1[%c0, %c0_0] : memref<16x2600xbf16, #tpu.memory_space<vmem>>, vector<16x2600xbf16>
    %1 = arith.mulf %0, %0 : vector<16x2600xbf16>
    %c0_1 = arith.constant 0 : index
    %c0_2 = arith.constant 0 : index
    %2 = vector.load %arg2[%c0_1, %c0_2] : memref<2600x128xbf16, #tpu.memory_space<vmem>>, vector<2600x128xbf16>
    %cst = arith.constant dense<0.000000e+00> : vector<16x128xf32>
    %3 = tpu.matmul %0, %2, %cst {dimension_numbers = #tpu.dot_dimension_numbers<[1], [0], [0], [1], [0, 0, 1, 1], [], []>} : vector<16x2600xbf16>, vector<2600x128xbf16>, vector<16x128xf32> -> vector<16x128xf32>
    %c0_3 = arith.constant 0 : index
    %c0_4 = arith.constant 0 : index
    %4 = vector.load %arg4[%c0_3, %c0_4] : memref<1x128xf32, #tpu.memory_space<vmem>>, vector<1x128xf32>
    %5 = vector.broadcast %4 : vector<1x128xf32> to vector<16x128xf32>
    %6 = arith.addf %3, %5 : vector<16x128xf32>
    %c0_5 = arith.constant 0 : index
    %c0_6 = arith.constant 0 : index
    %7 = vector.load %arg3[%c0_5, %c0_6] : memref<2600x128xbf16, #tpu.memory_space<vmem>>, vector<2600x128xbf16>
    %cst_7 = arith.constant dense<0.000000e+00> : vector<16x128xf32>
    %8 = tpu.matmul %1, %7, %cst_7 {dimension_numbers = #tpu.dot_dimension_numbers<[1], [0], [0], [1], [0, 0, 1, 1], [], []>} : vector<16x2600xbf16>, vector<2600x128xbf16>, vector<16x128xf32> -> vector<16x128xf32>
    %c0_8 = arith.constant 0 : index
    %c0_9 = arith.constant 0 : index
    %9 = vector.load %arg5[%c0_8, %c0_9] : memref<1x128xf32, #tpu.memory_space<vmem>>, vector<1x128xf32>
    %10 = vector.broadcast %9 : vector<1x128xf32> to vector<16x128xf32>
    %11 = arith.addf %8, %10 : vector<16x128xf32>
    %cst_10 = arith.constant 9.99999996E-13 : f32
    %12 = vector.broadcast %cst_10 : f32 to vector<16x128xf32>
    %13 = arith.maximumf %11, %12 : vector<16x128xf32>
    %14 = math.rsqrt %13 : vector<16x128xf32>
    %15 = arith.mulf %13, %14 : vector<16x128xf32>
    %16 = arith.mulf %6, %14 : vector<16x128xf32>
    %cst_11 = arith.constant 1.59576917 : f32
    %17 = vector.broadcast %cst_11 : f32 to vector<16x128xf32>
    %18 = arith.mulf %17, %16 : vector<16x128xf32>
    %19 = arith.negf %18 : vector<16x128xf32>
    %20 = math.exp %19 : vector<16x128xf32>
    %cst_12 = arith.constant 1.000000e+00 : f32
    %21 = vector.broadcast %cst_12 : f32 to vector<16x128xf32>
    %22 = arith.addf %21, %20 : vector<16x128xf32>
    %23 = arith.divf %21, %22 : vector<16x128xf32>
    %cst_13 = arith.constant -5.000000e-01 : f32
    %24 = vector.broadcast %cst_13 : f32 to vector<16x128xf32>
    %25 = arith.mulf %24, %16 : vector<16x128xf32>
    %26 = arith.mulf %25, %16 : vector<16x128xf32>
    %27 = math.exp %26 : vector<16x128xf32>
    %cst_14 = arith.constant 0.398942292 : f32
    %28 = vector.broadcast %cst_14 : f32 to vector<16x128xf32>
    %29 = arith.mulf %28, %27 : vector<16x128xf32>
    %30 = arith.mulf %23, %6 : vector<16x128xf32>
    %31 = arith.mulf %15, %29 : vector<16x128xf32>
    %32 = arith.addf %30, %31 : vector<16x128xf32>
    %33 = arith.mulf %6, %6 : vector<16x128xf32>
    %34 = arith.addf %33, %13 : vector<16x128xf32>
    %35 = arith.mulf %23, %34 : vector<16x128xf32>
    %36 = arith.mulf %6, %15 : vector<16x128xf32>
    %37 = arith.mulf %36, %29 : vector<16x128xf32>
    %38 = arith.addf %35, %37 : vector<16x128xf32>
    %39 = arith.mulf %32, %32 : vector<16x128xf32>
    %40 = arith.subf %38, %39 : vector<16x128xf32>
    %c0_15 = arith.constant 0 : index
    %c0_16 = arith.constant 0 : index
    %41 = vector.load %arg6[%c0_15, %c0_16] : memref<384x256xbf16, #tpu.memory_space<vmem>>, vector<384x256xbf16>
    %c0_17 = arith.constant 0 : index
    %c0_18 = arith.constant 0 : index
    %42 = vector.load %arg7[%c0_17, %c0_18] : memref<1x128xf32, #tpu.memory_space<vmem>>, vector<1x128xf32>
    %c0_19 = arith.constant 0 : index
    %c0_20 = arith.constant 0 : index
    %43 = vector.load %arg8[%c0_19, %c0_20] : memref<1x128xf32, #tpu.memory_space<vmem>>, vector<1x128xf32>
    %44 = arith.truncf %32 : vector<16x128xf32> to vector<16x128xbf16>
    %45 = arith.truncf %40 : vector<16x128xf32> to vector<16x128xbf16>
    %46 = arith.mulf %44, %44 : vector<16x128xbf16>
    %47 = tpu.concatenate %44, %45, %46 in 1 : vector<16x128xbf16>, vector<16x128xbf16>, vector<16x128xbf16> -> vector<16x384xbf16>
    %cst_21 = arith.constant dense<0.000000e+00> : vector<16x256xf32>
    %48 = tpu.matmul %47, %41, %cst_21 {dimension_numbers = #tpu.dot_dimension_numbers<[1], [0], [0], [1], [0, 0, 1, 1], [], []>} : vector<16x384xbf16>, vector<384x256xbf16>, vector<16x256xf32> -> vector<16x256xf32>
    %49 = vector.extract_strided_slice %48 {offsets = [0, 0], sizes = [16, 128], strides = [1, 1]} : vector<16x256xf32> to vector<16x128xf32>
    %50 = vector.broadcast %42 : vector<1x128xf32> to vector<16x128xf32>
    %51 = arith.addf %49, %50 : vector<16x128xf32>
    %52 = vector.extract_strided_slice %48 {offsets = [0, 128], sizes = [16, 128], strides = [1, 1]} : vector<16x256xf32> to vector<16x128xf32>
    %53 = vector.broadcast %43 : vector<1x128xf32> to vector<16x128xf32>
    %54 = arith.addf %52, %53 : vector<16x128xf32>
    %cst_22 = arith.constant 9.99999996E-13 : f32
    %55 = vector.broadcast %cst_22 : f32 to vector<16x128xf32>
    %56 = arith.maximumf %54, %55 : vector<16x128xf32>
    %57 = math.rsqrt %56 : vector<16x128xf32>
    %58 = arith.mulf %56, %57 : vector<16x128xf32>
    %59 = arith.mulf %51, %57 : vector<16x128xf32>
    %cst_23 = arith.constant 1.59576917 : f32
    %60 = vector.broadcast %cst_23 : f32 to vector<16x128xf32>
    %61 = arith.mulf %60, %59 : vector<16x128xf32>
    %62 = arith.negf %61 : vector<16x128xf32>
    %63 = math.exp %62 : vector<16x128xf32>
    %cst_24 = arith.constant 1.000000e+00 : f32
    %64 = vector.broadcast %cst_24 : f32 to vector<16x128xf32>
    %65 = arith.addf %64, %63 : vector<16x128xf32>
    %66 = arith.divf %64, %65 : vector<16x128xf32>
    %cst_25 = arith.constant -5.000000e-01 : f32
    %67 = vector.broadcast %cst_25 : f32 to vector<16x128xf32>
    %68 = arith.mulf %67, %59 : vector<16x128xf32>
    %69 = arith.mulf %68, %59 : vector<16x128xf32>
    %70 = math.exp %69 : vector<16x128xf32>
    %cst_26 = arith.constant 0.398942292 : f32
    %71 = vector.broadcast %cst_26 : f32 to vector<16x128xf32>
    %72 = arith.mulf %71, %70 : vector<16x128xf32>
    %73 = arith.mulf %66, %51 : vector<16x128xf32>
    %74 = arith.mulf %58, %72 : vector<16x128xf32>
    %75 = arith.addf %73, %74 : vector<16x128xf32>
    %76 = arith.mulf %51, %51 : vector<16x128xf32>
    %77 = arith.addf %76, %56 : vector<16x128xf32>
    %78 = arith.mulf %66, %77 : vector<16x128xf32>
    %79 = arith.mulf %51, %58 : vector<16x128xf32>
    %80 = arith.mulf %79, %72 : vector<16x128xf32>
    %81 = arith.addf %78, %80 : vector<16x128xf32>
    %82 = arith.mulf %75, %75 : vector<16x128xf32>
    %83 = arith.subf %81, %82 : vector<16x128xf32>
    %c0_27 = arith.constant 0 : index
    %c0_28 = arith.constant 0 : index
    %84 = vector.load %arg9[%c0_27, %c0_28] : memref<384x128xbf16, #tpu.memory_space<vmem>>, vector<384x128xbf16>
    %c0_29 = arith.constant 0 : index
    %c0_30 = arith.constant 0 : index
    %85 = vector.load %arg10[%c0_29, %c0_30] : memref<1x64xf32, #tpu.memory_space<vmem>>, vector<1x64xf32>
    %c0_31 = arith.constant 0 : index
    %c0_32 = arith.constant 0 : index
    %86 = vector.load %arg11[%c0_31, %c0_32] : memref<1x64xf32, #tpu.memory_space<vmem>>, vector<1x64xf32>
    %87 = arith.truncf %75 : vector<16x128xf32> to vector<16x128xbf16>
    %88 = arith.truncf %83 : vector<16x128xf32> to vector<16x128xbf16>
    %89 = arith.mulf %87, %87 : vector<16x128xbf16>
    %90 = tpu.concatenate %87, %88, %89 in 1 : vector<16x128xbf16>, vector<16x128xbf16>, vector<16x128xbf16> -> vector<16x384xbf16>
    %cst_33 = arith.constant dense<0.000000e+00> : vector<16x128xf32>
    %91 = tpu.matmul %90, %84, %cst_33 {dimension_numbers = #tpu.dot_dimension_numbers<[1], [0], [0], [1], [0, 0, 1, 1], [], []>} : vector<16x384xbf16>, vector<384x128xbf16>, vector<16x128xf32> -> vector<16x128xf32>
    %92 = vector.extract_strided_slice %91 {offsets = [0, 0], sizes = [16, 64], strides = [1, 1]} : vector<16x128xf32> to vector<16x64xf32>
    %93 = vector.broadcast %85 : vector<1x64xf32> to vector<16x64xf32>
    %94 = arith.addf %92, %93 : vector<16x64xf32>
    %95 = vector.extract_strided_slice %91 {offsets = [0, 64], sizes = [16, 64], strides = [1, 1]} : vector<16x128xf32> to vector<16x64xf32>
    %96 = vector.broadcast %86 : vector<1x64xf32> to vector<16x64xf32>
    %97 = arith.addf %95, %96 : vector<16x64xf32>
    %cst_34 = arith.constant 9.99999996E-13 : f32
    %98 = vector.broadcast %cst_34 : f32 to vector<16x64xf32>
    %99 = arith.maximumf %97, %98 : vector<16x64xf32>
    %100 = math.rsqrt %99 : vector<16x64xf32>
    %101 = arith.mulf %99, %100 : vector<16x64xf32>
    %102 = arith.mulf %94, %100 : vector<16x64xf32>
    %cst_35 = arith.constant 1.59576917 : f32
    %103 = vector.broadcast %cst_35 : f32 to vector<16x64xf32>
    %104 = arith.mulf %103, %102 : vector<16x64xf32>
    %105 = arith.negf %104 : vector<16x64xf32>
    %106 = math.exp %105 : vector<16x64xf32>
    %cst_36 = arith.constant 1.000000e+00 : f32
    %107 = vector.broadcast %cst_36 : f32 to vector<16x64xf32>
    %108 = arith.addf %107, %106 : vector<16x64xf32>
    %109 = arith.divf %107, %108 : vector<16x64xf32>
    %cst_37 = arith.constant -5.000000e-01 : f32
    %110 = vector.broadcast %cst_37 : f32 to vector<16x64xf32>
    %111 = arith.mulf %110, %102 : vector<16x64xf32>
    %112 = arith.mulf %111, %102 : vector<16x64xf32>
    %113 = math.exp %112 : vector<16x64xf32>
    %cst_38 = arith.constant 0.398942292 : f32
    %114 = vector.broadcast %cst_38 : f32 to vector<16x64xf32>
    %115 = arith.mulf %114, %113 : vector<16x64xf32>
    %116 = arith.mulf %109, %94 : vector<16x64xf32>
    %117 = arith.mulf %101, %115 : vector<16x64xf32>
    %118 = arith.addf %116, %117 : vector<16x64xf32>
    %119 = arith.mulf %94, %94 : vector<16x64xf32>
    %120 = arith.addf %119, %99 : vector<16x64xf32>
    %121 = arith.mulf %109, %120 : vector<16x64xf32>
    %122 = arith.mulf %94, %101 : vector<16x64xf32>
    %123 = arith.mulf %122, %115 : vector<16x64xf32>
    %124 = arith.addf %121, %123 : vector<16x64xf32>
    %125 = arith.mulf %118, %118 : vector<16x64xf32>
    %126 = arith.subf %124, %125 : vector<16x64xf32>
    %127 = arith.truncf %118 : vector<16x64xf32> to vector<16x64xbf16>
    %128 = arith.truncf %126 : vector<16x64xf32> to vector<16x64xbf16>
    %c0_39 = arith.constant 0 : index
    %c0_40 = arith.constant 0 : index
    %129 = vector.load %arg12[%c0_39, %c0_40] : memref<64x1xbf16, #tpu.memory_space<vmem>>, vector<64x1xbf16>
    %cst_41 = arith.constant dense<0.000000e+00> : vector<16x1xf32>
    %130 = tpu.matmul %127, %129, %cst_41 {dimension_numbers = #tpu.dot_dimension_numbers<[1], [0], [0], [1], [0, 0, 1, 1], [], []>} : vector<16x64xbf16>, vector<64x1xbf16>, vector<16x1xf32> -> vector<16x1xf32>
    %c0_42 = arith.constant 0 : index
    %c0_43 = arith.constant 0 : index
    %131 = vector.load %arg15[%c0_42, %c0_43] : memref<1x1xf32, #tpu.memory_space<vmem>>, vector<1x1xf32>
    %132 = vector.broadcast %131 : vector<1x1xf32> to vector<16x1xf32>
    %133 = arith.addf %130, %132 : vector<16x1xf32>
    %c0_44 = arith.constant 0 : index
    %c0_45 = arith.constant 0 : index
    %134 = vector.load %arg13[%c0_44, %c0_45] : memref<64x1xbf16, #tpu.memory_space<vmem>>, vector<64x1xbf16>
    %cst_46 = arith.constant dense<0.000000e+00> : vector<16x1xf32>
    %135 = tpu.matmul %128, %134, %cst_46 {dimension_numbers = #tpu.dot_dimension_numbers<[1], [0], [0], [1], [0, 0, 1, 1], [], []>} : vector<16x64xbf16>, vector<64x1xbf16>, vector<16x1xf32> -> vector<16x1xf32>
    %136 = arith.mulf %127, %127 : vector<16x64xbf16>
    %c0_47 = arith.constant 0 : index
    %c0_48 = arith.constant 0 : index
    %137 = vector.load %arg14[%c0_47, %c0_48] : memref<64x1xbf16, #tpu.memory_space<vmem>>, vector<64x1xbf16>
    %cst_49 = arith.constant dense<0.000000e+00> : vector<16x1xf32>
    %138 = tpu.matmul %136, %137, %cst_49 {dimension_numbers = #tpu.dot_dimension_numbers<[1], [0], [0], [1], [0, 0, 1, 1], [], []>} : vector<16x64xbf16>, vector<64x1xbf16>, vector<16x1xf32> -> vector<16x1xf32>
    %139 = arith.addf %135, %138 : vector<16x1xf32>
    %c0_50 = arith.constant 0 : index
    %c0_51 = arith.constant 0 : index
    %140 = vector.load %arg16[%c0_50, %c0_51] : memref<1x1xf32, #tpu.memory_space<vmem>>, vector<1x1xf32>
    %141 = vector.broadcast %140 : vector<1x1xf32> to vector<16x1xf32>
    %142 = arith.addf %139, %141 : vector<16x1xf32>
    %cst_52 = arith.constant 0.000000e+00 : f32
    %143 = vector.broadcast %cst_52 : f32 to vector<16x1xf32>
    %144 = arith.maximumf %142, %143 : vector<16x1xf32>
    %cst_53 = arith.constant 0.392699093 : f32
    %145 = vector.broadcast %cst_53 : f32 to vector<16x1xf32>
    %146 = arith.mulf %145, %144 : vector<16x1xf32>
    %cst_54 = arith.constant 1.000000e+00 : f32
    %147 = vector.broadcast %cst_54 : f32 to vector<16x1xf32>
    %148 = arith.addf %147, %146 : vector<16x1xf32>
    %149 = math.rsqrt %148 : vector<16x1xf32>
    %150 = arith.mulf %133, %149 : vector<16x1xf32>
    %151 = arith.negf %150 : vector<16x1xf32>
    %152 = math.exp %151 : vector<16x1xf32>
    %cst_55 = arith.constant 1.000000e+00 : f32
    %153 = vector.broadcast %cst_55 : f32 to vector<16x1xf32>
    %154 = arith.addf %153, %152 : vector<16x1xf32>
    %155 = arith.divf %153, %154 : vector<16x1xf32>
    %cst_56 = arith.constant -0.881373584 : f32
    %156 = vector.broadcast %cst_56 : f32 to vector<16x1xf32>
    %157 = arith.addf %133, %156 : vector<16x1xf32>
    %cst_57 = arith.constant 1.17157292 : f32
    %158 = vector.broadcast %cst_57 : f32 to vector<16x1xf32>
    %159 = arith.mulf %158, %157 : vector<16x1xf32>
    %cst_58 = arith.constant 0.539012074 : f32
    %160 = vector.broadcast %cst_58 : f32 to vector<16x1xf32>
    %161 = arith.mulf %160, %144 : vector<16x1xf32>
    %cst_59 = arith.constant 1.000000e+00 : f32
    %162 = vector.broadcast %cst_59 : f32 to vector<16x1xf32>
    %163 = arith.addf %162, %161 : vector<16x1xf32>
    %164 = math.rsqrt %163 : vector<16x1xf32>
    %165 = arith.mulf %159, %164 : vector<16x1xf32>
    %166 = arith.negf %165 : vector<16x1xf32>
    %167 = math.exp %166 : vector<16x1xf32>
    %cst_60 = arith.constant 1.000000e+00 : f32
    %168 = vector.broadcast %cst_60 : f32 to vector<16x1xf32>
    %169 = arith.addf %168, %167 : vector<16x1xf32>
    %170 = arith.divf %168, %169 : vector<16x1xf32>
    %171 = arith.mulf %155, %155 : vector<16x1xf32>
    %172 = arith.subf %170, %171 : vector<16x1xf32>
    %cst_61 = arith.constant 5.000000e-01 : f32
    %173 = vector.broadcast %cst_61 : f32 to vector<16x1xf32>
    %174 = arith.mulf %173, %172 : vector<16x1xf32>
    %175 = arith.addf %155, %174 : vector<16x1xf32>
    %c0_62 = arith.constant 0 : index
    %c0_63 = arith.constant 0 : index
    %176 = vector.load %arg17[%c0_62, %c0_63] : memref<16x1xf32, #tpu.memory_space<vmem>>, vector<16x1xf32>
    tpu.vector_store %arg17[%c0_62, %c0_63], %175 {strides = array<i32>} : memref<16x1xf32, #tpu.memory_space<vmem>>, vector<16x1xf32>,
    return
  }
  func.func @transform_0(%arg0: i32) -> (i32, i32) {
    %c0_i32 = arith.constant 0 : i32
    %c0_i32_0 = arith.constant 0 : i32
    return %arg0, %c0_i32 : i32, i32
  }
  func.func @transform_1(%arg0: i32) -> (i32, i32) {
    %c0_i32 = arith.constant 0 : i32
    %c0_i32_0 = arith.constant 0 : i32
    %c0_i32_1 = arith.constant 0 : i32
    return %c0_i32, %c0_i32_0 : i32, i32
  }
  func.func @transform_2(%arg0: i32) -> (i32, i32) {
    %c0_i32 = arith.constant 0 : i32
    %c0_i32_0 = arith.constant 0 : i32
    %c0_i32_1 = arith.constant 0 : i32
    return %c0_i32, %c0_i32_0 : i32, i32
  }
  func.func @transform_3(%arg0: i32) -> (i32, i32) {
    %c0_i32 = arith.constant 0 : i32
    %c0_i32_0 = arith.constant 0 : i32
    %c0_i32_1 = arith.constant 0 : i32
    return %c0_i32, %c0_i32_0 : i32, i32
  }
  func.func @transform_4(%arg0: i32) -> (i32, i32) {
    %c0_i32 = arith.constant 0 : i32
    %c0_i32_0 = arith.constant 0 : i32
    %c0_i32_1 = arith.constant 0 : i32
    return %c0_i32, %c0_i32_0 : i32, i32
  }
  func.func @transform_5(%arg0: i32) -> (i32, i32) {
    %c0_i32 = arith.constant 0 : i32
    %c0_i32_0 = arith.constant 0 : i32
    %c0_i32_1 = arith.constant 0 : i32
    return %c0_i32, %c0_i32_0 : i32, i32
  }
  func.func @transform_6(%arg0: i32) -> (i32, i32) {
    %c0_i32 = arith.constant 0 : i32
    %c0_i32_0 = arith.constant 0 : i32
    %c0_i32_1 = arith.constant 0 : i32
    return %c0_i32, %c0_i32_0 : i32, i32
  }
  func.func @transform_7(%arg0: i32) -> (i32, i32) {
    %c0_i32 = arith.constant 0 : i32
    %c0_i32_0 = arith.constant 0 : i32
    %c0_i32_1 = arith.constant 0 : i32
    return %c0_i32, %c0_i32_0 : i32, i32
  }
  func.func @transform_8(%arg0: i32) -> (i32, i32) {
    %c0_i32 = arith.constant 0 : i32
    %c0_i32_0 = arith.constant 0 : i32
    %c0_i32_1 = arith.constant 0 : i32
    return %c0_i32, %c0_i32_0 : i32, i32
  }
  func.func @transform_9(%arg0: i32) -> (i32, i32) {
    %c0_i32 = arith.constant 0 : i32
    %c0_i32_0 = arith.constant 0 : i32
    %c0_i32_1 = arith.constant 0 : i32
    return %c0_i32, %c0_i32_0 : i32, i32
  }
  func.func @transform_10(%arg0: i32) -> (i32, i32) {
    %c0_i32 = arith.constant 0 : i32
    %c0_i32_0 = arith.constant 0 : i32
    %c0_i32_1 = arith.constant 0 : i32
    return %c0_i32, %c0_i32_0 : i32, i32
  }
  func.func @transform_11(%arg0: i32) -> (i32, i32) {
    %c0_i32 = arith.constant 0 : i32
    %c0_i32_0 = arith.constant 0 : i32
    %c0_i32_1 = arith.constant 0 : i32
    return %c0_i32, %c0_i32_0 : i32, i32
  }
  func.func @transform_12(%arg0: i32) -> (i32, i32) {
    %c0_i32 = arith.constant 0 : i32
    %c0_i32_0 = arith.constant 0 : i32
    %c0_i32_1 = arith.constant 0 : i32
    return %c0_i32, %c0_i32_0 : i32, i32
  }
  func.func @transform_13(%arg0: i32) -> (i32, i32) {
    %c0_i32 = arith.constant 0 : i32
    %c0_i32_0 = arith.constant 0 : i32
    %c0_i32_1 = arith.constant 0 : i32
    return %c0_i32, %c0_i32_0 : i32, i32
  }
  func.func @transform_14(%arg0: i32) -> (i32, i32) {
    %c0_i32 = arith.constant 0 : i32
    %c0_i32_0 = arith.constant 0 : i32
    %c0_i32_1 = arith.constant 0 : i32
    return %c0_i32, %c0_i32_0 : i32, i32
  }
  func.func @transform_15(%arg0: i32) -> (i32, i32) {
    %c0_i32 = arith.constant 0 : i32
    %c0_i32_0 = arith.constant 0 : i32
    %c0_i32_1 = arith.constant 0 : i32
    return %c0_i32, %c0_i32_0 : i32, i32
  }
  func.func @transform_16(%arg0: i32) -> (i32, i32) {
    %c0_i32 = arith.constant 0 : i32
    %c0_i32_0 = arith.constant 0 : i32
    return %arg0, %c0_i32 : i32, i32
  }
}

</mosaic_0001>

<bundles_post_ra>
// kernel: _forward.1
= control target key start
LH: loop header
LB: loop body
LE: loop exit
PB: predicated region body
PF: predicated region fallthrough
CT: control target
= control target key end

     0   :  { %s7944_s0 = inlined_call_operand.vmem [shape: bf16[16,2600], index: 0, kind: input, shape index: {}]   ;;  %s7945_s1 = inlined_call_operand.vmem [shape: bf16[2600,128], index: 1, kind: input, shape index: {}]   ;;  %s7946_s2 = inlined_call_operand.hbm [shape: bf16[2600,128], index: 2, kind: input, shape index: {}]   ;;  %s7947_s3 = inlined_call_operand.vmem [shape: f32[1,128], index: 3, kind: input, shape index: {}]   ;;  %s7948_s4 = inlined_call_operand.vmem [shape: f32[1,128], index: 4, kind: input, shape index: {}]   ;;  %s7949_s5 = inlined_call_operand.vmem [shape: bf16[384,256], index: 5, kind: input, shape index: {}]   ;;  %s7950_s6 = inlined_call_operand.vmem [shape: f32[1,128], index: 6, kind: input, shape index: {}]   ;;  %s7951_s7 = inlined_call_operand.vmem [shape: f32[1,128], index: 7, kind: input, shape index: {}]   ;;  %s7952_s8 = inlined_call_operand.hbm [shape: bf16[384,128], index: 8, kind: input, shape index: {}]   ;;  %s7953_s9 = inlined_call_operand.vmem [shape: f32[1,64], index: 9, kind: input, shape index: {}]   ;;  %s7954_s10 = inlined_call_operand.vmem [shape: f32[1,64], index: 10, kind: input, shape index: {}]   ;;  %s7955_s11 = inlined_call_operand.vmem [shape: bf16[64,1], index: 11, kind: input, shape index: {}]   ;;  %s7956_s12 = inlined_call_operand.vmem [shape: bf16[64,1], index: 12, kind: input, shape index: {}]   ;;  %s7957_s13 = inlined_call_operand.vmem [shape: bf16[64,1], index: 13, kind: input, shape index: {}]   ;;  %s7958_s14 = inlined_call_operand.<no memory space> [shape: f32[1,1], index: 14, kind: input, shape index: {}]   ;;  %s7959_s16 = inlined_call_operand.vmem [shape: f32[16,1], index: 16, kind: output, shape index: {}]   ;;  %s7960_s15 = inlined_call_operand.<no memory space> [shape: f32[1,1], index: 15, kind: input, shape index: {}]  }
   0x1   :  { %7962 = sst [smem:[#allocation10_spill]] %s7944_s0  ;;  %v21_v0 = vstv %s7958_s14  ;;  %v23_v1 = vstv %s7960_s15 }
   0x2   :  { %22 = vst [vmem:[#allocation2] sm:$0x1] %v21_v0  ;;  %24 = vst [vmem:[#allocation3] sm:$0x1] %v23_v1 }
   0x3   :  { %25 = vsyncpa [#allocation5], 0 }
   0x4   :  { %26 = vsyncpa [#allocation7], 0  ;;  %s6706_s25 = smov [#allocation4]   ;;  %s6658_s29 = scalar_lea.hbm %s7946_s2, 20800 }
   0x5   :  { %s36_s26 = sshll.u32 %s6706_s25, 4  ;;  %p6659_p0 = scmp.ne.s32.totalorder %s7946_s2, %s6658_s29  ;;  %s37_s26 = int_to_ptr.vmem [resolvable:$true] %s36_s26 }
   0x6   :  { %p6662_p1 = scmp.lt.u32.totalorder %s6658_s29, %s7946_s2 }
   0x8   :  { %p6664_p2 = pnand %p6662_p1, %p6659_p0 }
   0xa   :  { %6667 = shalt.err (!%p6664_p2)
}
   0xb   :  { %s6668_s15 = scalar_lea.vmem %s37_s26, 20800  ;;  %p6673_p4 = scmp.lt.s32.totalorder %s37_s26, %s37_s26 }
   0xc   :  { %p6669_p3 = scmp.ne.s32.totalorder %s37_s26, %s6668_s15  ;;  %p6674_p5 = scmp.lt.s32.totalorder %s6668_s15, %s6668_s15 }
   0xe   :  { %p6675_p6 = por %p6674_p5, %p6673_p4 }
  0x10   :  { %p6676_p7 = pnand %p6675_p6, %p6669_p3 }
  0x12   :  { %6679 = shalt.err (!%p6676_p7)
}
  0x13   :  { %s6707_s18 = smov 64   ;;  %s6708_s19 = smov 4  }
  0x14   :  { %42 = dma.hbm_to_vmem [thread:$0]  %s7946_s2, 20800, %s37_s26, [#allocation5], %s6707_s18, %s6707_s18, %s6708_s19  }
  0x15   :  { %s6709_s22 = smov [#allocation6]   ;;  %s6680_s27 = scalar_lea.hbm %s7952_s8, 3072 }
  0x16   :  { %s58_s23 = sshll.u32 %s6709_s22, 4  ;;  %p6681_p8 = scmp.ne.s32.totalorder %s7952_s8, %s6680_s27  ;;  %s59_s23 = int_to_ptr.vmem [resolvable:$true] %s58_s23 }
  0x17   :  { %p6684_p9 = scmp.lt.u32.totalorder %s6680_s27, %s7952_s8 }
  0x19   :  { %p6686_p10 = pnand %p6684_p9, %p6681_p8 }
  0x1b   :  { %6689 = shalt.err (!%p6686_p10)
}
  0x1c   :  { %s6690_s14 = scalar_lea.vmem %s59_s23, 3072  ;;  %p6695_p12 = scmp.lt.s32.totalorder %s59_s23, %s59_s23 }
  0x1d   :  { %p6691_p11 = scmp.ne.s32.totalorder %s59_s23, %s6690_s14  ;;  %p6696_p13 = scmp.lt.s32.totalorder %s6690_s14, %s6690_s14 }
  0x1f   :  { %p6697_p0 = por %p6696_p13, %p6695_p12 }
  0x21   :  { %p6698_p1 = pnand %p6697_p0, %p6691_p11 }
  0x23   :  { %6701 = shalt.err (!%p6698_p1)
}
  0x24   :  { %64 = dma.hbm_to_vmem [thread:$0]  %s7952_s8, 3072, %s59_s23, [#allocation7], %s6707_s18, %s6707_s18, %s6708_s19  }
  0x25   :  { %6702 = dma.done.wait [#allocation5], 20800  }
  0x26   :  { %6703 = vsyncadd [#allocation5], 4294946496 }
  0x27   :  { %6704 = dma.done.wait [#allocation7], 3072  }
  0x28   :  { %6705 = vsyncadd [#allocation7], 4294964224  ;;  %v6131_v2 = vld [vmem:[%s7945_s1 + $0x40] sm:$0xff]   ;;  %v6135_v6 = vld [vmem:[%s7945_s1 + $0x48] sm:$0xff]   ;;  %s7963_s29 = sld [smem:[#allocation10_spill]]  ;;  %vm6711_vm0 = vmmov 0  }
  0x29   :  { %v6132_v3 = vld [vmem:[%s7945_s1 + $0xc0] sm:$0xff]   ;;  %5550 = vmatprep.subr.bf16.mxu0 %v6131_v2  ;;  %v6136_v7 = vld [vmem:[%s7945_s1 + $0xc8] sm:$0xff]   ;;  %v6139_v10 = vld [vmem:[%s7945_s1 + $0x50] sm:$0xff]   ;;  %vm1546_vm1 = vcmask 1043456   ;;  %vm1542_vm2 = vcmask 326656   ;;  %vm4805_vm3 = vcmask 523264  }
  0x2a   :  { %v6133_v4 = vld [vmem:[%s7945_s1] sm:$0xff]   ;;  %5572 = vmatprep.subr.bf16.mxu1 %v6132_v3  ;;  %v6137_v8 = vld [vmem:[%s7945_s1 + $0x8] sm:$0xff]   ;;  %v6140_v11 = vld [vmem:[%s7945_s1 + $0xd0] sm:$0xff]   ;;  %vm5066_vm4 = vcmask 7168  }
  0x2b   :  { %v6134_v5 = vld [vmem:[%s7945_s1 + $0x80] sm:$0xff]   ;;  %5551 = vmatpush3.bf16.msra.mxu0 %v6133_v4  ;;  %v6138_v9 = vld [vmem:[%s7945_s1 + $0x88] sm:$0xff]   ;;  %v6141_v12 = vld [vmem:[%s7945_s1 + $0x10] sm:$0xff]  }
  0x2c   :  { %5573 = vmatpush3.bf16.msra.mxu1 %v6134_v5  ;;  %5552 = vmatprep.subr.bf16.mxu0 %v6135_v6  ;;  %v6142_v13 = vld [vmem:[%s7945_s1 + $0x90] sm:$0xff]   ;;  %v6143_v14 = vld [vmem:[%s7945_s1 + $0x58] sm:$0xff]   ;;  %v6147_v18 = vld [vmem:[%s7945_s1 + $0x60] sm:$0xff]  }
  0x2d   :  { %5574 = vmatprep.subr.bf16.mxu1 %v6136_v7  ;;  %v6144_v15 = vld [vmem:[%s7945_s1 + $0xd8] sm:$0xff]   ;;  %v6148_v19 = vld [vmem:[%s7945_s1 + $0xe0] sm:$0xff]   ;;  %v6151_v22 = vld [vmem:[%s7945_s1 + $0x68] sm:$0xff]  }
  0x2e   :  { %v6145_v16 = vld [vmem:[%s7945_s1 + $0x18] sm:$0xff]   ;;  %v6149_v20 = vld [vmem:[%s7945_s1 + $0x20] sm:$0xff]   ;;  %v6152_v23 = vld [vmem:[%s7945_s1 + $0xe8] sm:$0xff]  }
  0x2f   :  { %5553 = vmatpush3.bf16.msra.mxu0 %v6137_v8  ;;  %v6146_v17 = vld [vmem:[%s7945_s1 + $0x98] sm:$0xff]   ;;  %v6150_v21 = vld [vmem:[%s7945_s1 + $0xa0] sm:$0xff]   ;;  %v6153_v24 = vld [vmem:[%s7945_s1 + $0x28] sm:$0xff]  }
  0x30   :  { %5575 = vmatpush3.bf16.msra.mxu1 %v6138_v9  ;;  %5554 = vmatprep.subr.bf16.mxu0 %v6139_v10  ;;  %v6154_v25 = vld [vmem:[%s7945_s1 + $0xa8] sm:$0xff]   ;;  %v6155_v26 = vld [vmem:[%s7945_s1 + $0x70] sm:$0xff]   ;;  %v6159_v30 = vld [vmem:[%s7945_s1 + $0x78] sm:$0xff]  }
  0x31   :  { %5576 = vmatprep.subr.bf16.mxu1 %v6140_v11  ;;  %v6156_v27 = vld [vmem:[%s7945_s1 + $0xf0] sm:$0xff]   ;;  %v6160_v31 = vld [vmem:[%s7945_s1 + $0xf8] sm:$0xff]   ;;  %v86_v34 = vld [vmem:[%s7963_s29] sm:$0xff] }
  0x32   :  { %v6157_v28 = vld [vmem:[%s7945_s1 + $0x30] sm:$0xff]   ;;  %v6161_v32 = vld [vmem:[%s7945_s1 + $0x38] sm:$0xff]   ;;  %v87_v36 = vld [vmem:[%s7963_s29 + $0x8] sm:$0xff]  ;;  %v6937_v37 = vmul.bf16 %v86_v34, %v86_v34 }
  0x33   :  { %5555 = vmatpush3.bf16.msra.mxu0 %v6141_v12  ;;  %v6158_v29 = vld [vmem:[%s7945_s1 + $0xb0] sm:$0xff]   ;;  %v6162_v33 = vld [vmem:[%s7945_s1 + $0xb8] sm:$0xff]   ;;  %v6944_v41 = vmul.bf16 %v87_v36, %v87_v36  ;;  %v6167_v46 = vld [vmem:[%s7945_s1 + $0x140] sm:$0xff]  }
  0x34   :  { %5577 = vmatpush3.bf16.msra.mxu1 %v6142_v13  ;;  %5556 = vmatprep.subr.bf16.mxu0 %v6143_v14  ;;  %v97_v35 = vld [vmem:[%s7963_s29 + $0x54] sm:$0xff]  ;;  %v98_v40 = vld [vmem:[%s7963_s29 + $0x5c] sm:$0xff]  ;;  %v6171_v52 = vld [vmem:[%s7945_s1 + $0x148] sm:$0xff]  }
  0x35   :  { %5578 = vmatprep.subr.bf16.mxu1 %v6144_v15  ;;  %v6939_v38 = vmul.bf16 %v97_v35, %v97_v35  ;;  %v5077_v39 = vcombine.high %v86_v34, %v97_v35  ;;  %v6946_v42 = vmul.bf16 %v98_v40, %v98_v40  ;;  %v5079_v43 = vcombine.high %v87_v36, %v98_v40  ;;  %v6168_v48 = vld [vmem:[%s7945_s1 + $0x1c0] sm:$0xff]   ;;  %v6172_v53 = vld [vmem:[%s7945_s1 + $0x1c8] sm:$0xff]   ;;  %v6175_v56 = vld [vmem:[%s7945_s1 + $0x150] sm:$0xff]  }
  0x36   :  { %v5076_v44 = vcombine.low %v86_v34, %v97_v35  ;;  %v5078_v45 = vcombine.low %v87_v36, %v98_v40  ;;  %v6169_v50 = vld [vmem:[%s7945_s1 + $0x100] sm:$0xff]   ;;  %v6173_v54 = vld [vmem:[%s7945_s1 + $0x108] sm:$0xff]   ;;  %v6176_v57 = vld [vmem:[%s7945_s1 + $0x1d0] sm:$0xff]  }
  0x37   :  { %5557 = vmatpush3.bf16.msra.mxu0 %v6145_v16  ;;  %1582 = vmatprep.mubr.bf16.mxu0 %v5077_v39  ;;  %v5262_v47 = vcombine.low %v6937_v37, %v6939_v38  ;;  %v5264_v49 = vcombine.low %v6944_v41, %v6946_v42  ;;  %v6170_v51 = vld [vmem:[%s7945_s1 + $0x180] sm:$0xff]   ;;  %v6174_v55 = vld [vmem:[%s7945_s1 + $0x188] sm:$0xff]   ;;  %v6177_v58 = vld [vmem:[%s7945_s1 + $0x110] sm:$0xff]  }
  0x38   :  { %5579 = vmatpush3.bf16.msra.mxu1 %v6146_v17  ;;  %5558 = vmatprep.subr.bf16.mxu0 %v6147_v18  ;;  %v6178_v59 = vld [vmem:[%s7945_s1 + $0x190] sm:$0xff]   ;;  %v6179_v60 = vld [vmem:[%s7945_s1 + $0x158] sm:$0xff]   ;;  %v6183_v0 = vld [vmem:[%s7945_s1 + $0x160] sm:$0xff]  }
  0x39   :  { %5580 = vmatprep.subr.bf16.mxu1 %v6148_v19  ;;  %1623 = vmatprep.mubr.bf16.mxu1 %v5079_v43  ;;  %v6180_v61 = vld [vmem:[%s7945_s1 + $0x1d8] sm:$0xff]   ;;  %v6184_v1 = vld [vmem:[%s7945_s1 + $0x1e0] sm:$0xff]   ;;  %v6187_v4 = vld [vmem:[%s7945_s1 + $0x168] sm:$0xff]  }
  0x3a   :  { %v6181_v62 = vld [vmem:[%s7945_s1 + $0x118] sm:$0xff]   ;;  %v6185_v2 = vld [vmem:[%s7945_s1 + $0x120] sm:$0xff]   ;;  %v6188_v5 = vld [vmem:[%s7945_s1 + $0x1e8] sm:$0xff]  }
  0x3b   :  { %5559 = vmatpush3.bf16.msra.mxu0 %v6149_v20  ;;  %v6182_v63 = vld [vmem:[%s7945_s1 + $0x198] sm:$0xff]   ;;  %v6186_v3 = vld [vmem:[%s7945_s1 + $0x1a0] sm:$0xff]   ;;  %v6189_v6 = vld [vmem:[%s7945_s1 + $0x128] sm:$0xff]  }
  0x3c   :  { %5581 = vmatpush3.bf16.msra.mxu1 %v6150_v21  ;;  %5560 = vmatprep.subr.bf16.mxu0 %v6151_v22  ;;  %v6190_v7 = vld [vmem:[%s7945_s1 + $0x1a8] sm:$0xff]   ;;  %v6191_v8 = vld [vmem:[%s7945_s1 + $0x170] sm:$0xff]   ;;  %v6195_v12 = vld [vmem:[%s7945_s1 + $0x178] sm:$0xff]  }
  0x3d   :  { %5582 = vmatprep.subr.bf16.mxu1 %v6152_v23  ;;  %v6192_v9 = vld [vmem:[%s7945_s1 + $0x1f0] sm:$0xff]   ;;  %v6196_v13 = vld [vmem:[%s7945_s1 + $0x1f8] sm:$0xff]   ;;  %v7056_v17 = vld [vmem:[%s7963_s29 + $0x64] sm:$0xff] }
  0x3e   :  { %v6193_v10 = vld [vmem:[%s7945_s1 + $0x130] sm:$0xff]   ;;  %v6197_v14 = vld [vmem:[%s7945_s1 + $0x138] sm:$0xff]  }
  0x3f   :  { %5561 = vmatpush3.bf16.msra.mxu0 %v6153_v24  ;;  %v6194_v11 = vld [vmem:[%s7945_s1 + $0x1b0] sm:$0xff]   ;;  %v6198_v15 = vld [vmem:[%s7945_s1 + $0x1b8] sm:$0xff]   ;;  %v6203_v24 = vld [vmem:[%s7945_s1 + $0x240] sm:$0xff]  }
  0x40   :  { %5583 = vmatpush3.bf16.msra.mxu1 %v6154_v25  ;;  %5562 = vmatprep.subr.bf16.mxu0 %v6155_v26  ;;  %v7051_v16 = vld [vmem:[%s7963_s29 + $0x10] sm:$0xff]  ;;  %v7063_v19 = vld [vmem:[%s7963_s29 + $0x18] sm:$0xff]  ;;  %v6204_v25 = vld [vmem:[%s7945_s1 + $0x2c0] sm:$0xff]  }
  0x41   :  { %5584 = vmatprep.subr.bf16.mxu1 %v6156_v27  ;;  %v5081_v18 = vcombine.high %v7051_v16, %v7056_v17  ;;  %v7068_v20 = vld [vmem:[%s7963_s29 + $0x6c] sm:$0xff]  ;;  %v5080_v21 = vcombine.low %v7051_v16, %v7056_v17  ;;  %v6205_v26 = vld [vmem:[%s7945_s1 + $0x200] sm:$0xff]   ;;  %v6215_v36 = vld [vmem:[%s7945_s1 + $0x258] sm:$0xff]  }
  0x42   :  { %v5083_v22 = vcombine.high %v7063_v19, %v7068_v20  ;;  %v5082_v23 = vcombine.low %v7063_v19, %v7068_v20  ;;  %v6206_v27 = vld [vmem:[%s7945_s1 + $0x280] sm:$0xff]   ;;  %v6213_v34 = vld [vmem:[%s7945_s1 + $0x210] sm:$0xff]   ;;  %v6216_v39 = vld [vmem:[%s7945_s1 + $0x2d8] sm:$0xff]  }
  0x43   :  { %5563 = vmatpush3.bf16.msra.mxu0 %v6157_v28  ;;  %v6207_v28 = vld [vmem:[%s7945_s1 + $0x248] sm:$0xff]   ;;  %v6214_v35 = vld [vmem:[%s7945_s1 + $0x290] sm:$0xff]   ;;  %v6217_v40 = vld [vmem:[%s7945_s1 + $0x218] sm:$0xff]  }
  0x44   :  { %5585 = vmatpush3.bf16.msra.mxu1 %v6158_v29  ;;  %5564 = vmatprep.subr.bf16.mxu0 %v6159_v30  ;;  %v6208_v29 = vld [vmem:[%s7945_s1 + $0x2c8] sm:$0xff]   ;;  %v6218_v43 = vld [vmem:[%s7945_s1 + $0x298] sm:$0xff]  }
  0x45   :  { %5586 = vmatprep.subr.bf16.mxu1 %v6160_v31  ;;  %v6209_v30 = vld [vmem:[%s7945_s1 + $0x208] sm:$0xff]  }
  0x46   :  { %v6210_v31 = vld [vmem:[%s7945_s1 + $0x288] sm:$0xff]  }
  0x47   :  { %5565 = vmatpush3.bf16.msra.mxu0 %v6161_v32  ;;  %v6211_v32 = vld [vmem:[%s7945_s1 + $0x250] sm:$0xff]  }
  0x48   :  { %5587 = vmatpush3.bf16.msra.mxu1 %v6162_v33  ;;  %5594 = vmatprep.subr.bf16.mxu0 %v6167_v46  ;;  %v6212_v33 = vld [vmem:[%s7945_s1 + $0x2d0] sm:$0xff]   ;;  %v6220_v46 = vld [vmem:[%s7945_s1 + $0x2e0] sm:$0xff]  }
  0x49   :  { %5616 = vmatprep.subr.bf16.mxu1 %v6168_v48  ;;  %v6221_v48 = vld [vmem:[%s7945_s1 + $0x220] sm:$0xff]  }
  0x4a   :  { %1583 = vmatmul.mubr.bf16.vlgmr.msra.gmra.mrb[0].mxu0 %v5076_v44  ;;  %v6219_v44 = vld [vmem:[%s7945_s1 + $0x260] sm:$0xff]  }
  0x4b   :  { %1624 = vmatmul.mubr.bf16.vlgmr.msra.gmra.mrb[0].mxu1 %v5078_v45  ;;  %5595 = vmatpush3.bf16.msra.mxu0 %v6169_v50  ;;  %v5263_v45 = vcombine.high %v6937_v37, %v6939_v38  ;;  %v5265_v50 = vcombine.high %v6944_v41, %v6946_v42  ;;  %v6348_v41 = vld [vmem:[#allocation4 + $0x100] sm:$0xff]   ;;  %v6351_v42 = vld [vmem:[#allocation4 + $0x148] sm:$0xff]   ;;  %v6356_v37 = vld [vmem:[#allocation4 + $0x110] sm:$0xff]  }
  0x4c   :  { %5617 = vmatpush3.bf16.msra.mxu1 %v6170_v51  ;;  %5596 = vmatprep.subr.bf16.mxu0 %v6171_v52  ;;  %v6222_v51 = vld [vmem:[%s7945_s1 + $0x2a0] sm:$0xff]   ;;  %v6223_v52 = vld [vmem:[%s7945_s1 + $0x268] sm:$0xff]  }
  0x4d   :  { %5618 = vmatprep.subr.bf16.mxu1 %v6172_v53  ;;  %1664 = vmatprep.mubr.bf16.mxu0 %v5081_v18  ;;  %v6224_v53 = vld [vmem:[%s7945_s1 + $0x2e8] sm:$0xff]   ;;  %v6247_v18 = vld [vmem:[%s7945_s1 + $0x350] sm:$0xff]   ;;  %v6359_v38 = vld [vmem:[#allocation4 + $0x158] sm:$0xff]  }
  0x4e   :  { %1705 = vmatprep.mubr.bf16.mxu1 %v5083_v22  ;;  %v6249_v22 = vld [vmem:[%s7945_s1 + $0x310] sm:$0xff]  }
  0x4f   :  { %5597 = vmatpush3.bf16.msra.mxu0 %v6173_v54  ;;  %v6225_v54 = vld [vmem:[%s7945_s1 + $0x228] sm:$0xff]  }
  0x50   :  { %5619 = vmatpush3.bf16.msra.mxu1 %v6174_v55  ;;  %5598 = vmatprep.subr.bf16.mxu0 %v6175_v56  ;;  %v6226_v55 = vld [vmem:[%s7945_s1 + $0x2a8] sm:$0xff]   ;;  %v6227_v56 = vld [vmem:[%s7945_s1 + $0x270] sm:$0xff]  }
  0x51   :  { %5620 = vmatprep.subr.bf16.mxu1 %v6176_v57  ;;  %v6228_v57 = vld [vmem:[%s7945_s1 + $0x2f0] sm:$0xff]  }
  0x53   :  { %5599 = vmatpush3.bf16.msra.mxu0 %v6177_v58  ;;  %v6229_v58 = vld [vmem:[%s7945_s1 + $0x230] sm:$0xff]  }
  0x54   :  { %5621 = vmatpush3.bf16.msra.mxu1 %v6178_v59  ;;  %5600 = vmatprep.subr.bf16.mxu0 %v6179_v60  ;;  %v6230_v59 = vld [vmem:[%s7945_s1 + $0x2b0] sm:$0xff]   ;;  %v6231_v60 = vld [vmem:[%s7945_s1 + $0x278] sm:$0xff]  }
  0x55   :  { %5622 = vmatprep.subr.bf16.mxu1 %v6180_v61  ;;  %v6232_v61 = vld [vmem:[%s7945_s1 + $0x2f8] sm:$0xff]  }
  0x57   :  { %5601 = vmatpush3.bf16.msra.mxu0 %v6181_v62  ;;  %v6233_v62 = vld [vmem:[%s7945_s1 + $0x238] sm:$0xff]  }
  0x58   :  { %5623 = vmatpush3.bf16.msra.mxu1 %v6182_v63  ;;  %5602 = vmatprep.subr.bf16.mxu0 %v6183_v0  ;;  %v6234_v63 = vld [vmem:[%s7945_s1 + $0x2b8] sm:$0xff]   ;;  %v7179_v0 = vld [vmem:[%s7963_s29 + $0x20] sm:$0xff] }
  0x59   :  { %5624 = vmatprep.subr.bf16.mxu1 %v6184_v1  ;;  %v7184_v1 = vld [vmem:[%s7963_s29 + $0x74] sm:$0xff] }
  0x5b   :  { %5603 = vmatpush3.bf16.msra.mxu0 %v6185_v2  ;;  %v7189_v2 = vld [vmem:[%s7963_s29 + $0x28] sm:$0xff] }
  0x5c   :  { %5625 = vmatpush3.bf16.msra.mxu1 %v6186_v3  ;;  %5604 = vmatprep.subr.bf16.mxu0 %v6187_v4  ;;  %v7194_v3 = vld [vmem:[%s7963_s29 + $0x7c] sm:$0xff]  ;;  %v5085_v4 = vcombine.high %v7179_v0, %v7184_v1 }
  0x5d   :  { %5626 = vmatprep.subr.bf16.mxu1 %v6188_v5  ;;  %v5087_v5 = vcombine.high %v7189_v2, %v7194_v3 }
  0x5f   :  { %5605 = vmatpush3.bf16.msra.mxu0 %v6189_v6  ;;  %v5084_v6 = vcombine.low %v7179_v0, %v7184_v1 }
  0x60   :  { %5627 = vmatpush3.bf16.msra.mxu1 %v6190_v7  ;;  %5606 = vmatprep.subr.bf16.mxu0 %v6191_v8  ;;  %v5086_v7 = vcombine.low %v7189_v2, %v7194_v3  ;;  %v6239_v8 = vld [vmem:[%s7945_s1 + $0x340] sm:$0xff]  }
  0x61   :  { %5628 = vmatprep.subr.bf16.mxu1 %v6192_v9  ;;  %v6240_v9 = vld [vmem:[%s7945_s1 + $0x3c0] sm:$0xff]  }
  0x63   :  { %5607 = vmatpush3.bf16.msra.mxu0 %v6193_v10  ;;  %v6241_v10 = vld [vmem:[%s7945_s1 + $0x300] sm:$0xff]  }
  0x64   :  { %5629 = vmatpush3.bf16.msra.mxu1 %v6194_v11  ;;  %5608 = vmatprep.subr.bf16.mxu0 %v6195_v12  ;;  %v6242_v11 = vld [vmem:[%s7945_s1 + $0x380] sm:$0xff]   ;;  %v6243_v12 = vld [vmem:[%s7945_s1 + $0x348] sm:$0xff]  }
  0x65   :  { %5630 = vmatprep.subr.bf16.mxu1 %v6196_v13  ;;  %v6244_v13 = vld [vmem:[%s7945_s1 + $0x3c8] sm:$0xff]  }
  0x67   :  { %5609 = vmatpush3.bf16.msra.mxu0 %v6197_v14  ;;  %v6245_v14 = vld [vmem:[%s7945_s1 + $0x308] sm:$0xff]  }
  0x68   :  { %5631 = vmatpush3.bf16.msra.mxu1 %v6198_v15  ;;  %5638 = vmatprep.subr.bf16.mxu0 %v6203_v24  ;;  %v6246_v15 = vld [vmem:[%s7945_s1 + $0x388] sm:$0xff]   ;;  %v6251_v24 = vld [vmem:[%s7945_s1 + $0x358] sm:$0xff]  }
  0x69   :  { %5660 = vmatprep.subr.bf16.mxu1 %v6204_v25  ;;  %v6252_v25 = vld [vmem:[%s7945_s1 + $0x3d8] sm:$0xff]  }
  0x6a   :  { %1665 = vmatmul.mubr.bf16.vlgmr.msra.gmra.mrb[4].mxu0 %v5080_v21  ;;  %v6248_v21 = vld [vmem:[%s7945_s1 + $0x3d0] sm:$0xff]  }
  0x6b   :  { %1706 = vmatmul.mubr.bf16.vlgmr.msra.gmra.mrb[4].mxu1 %v5082_v23  ;;  %5639 = vmatpush3.bf16.msra.mxu0 %v6205_v26  ;;  %v6250_v23 = vld [vmem:[%s7945_s1 + $0x390] sm:$0xff]   ;;  %v7248_v26 = vmul.bf16 %v7051_v16, %v7051_v16 }
  0x6c   :  { %5661 = vmatpush3.bf16.msra.mxu1 %v6206_v27  ;;  %5640 = vmatprep.subr.bf16.mxu0 %v6207_v28  ;;  %v7252_v27 = vmul.bf16 %v7056_v17, %v7056_v17  ;;  %v6253_v28 = vld [vmem:[%s7945_s1 + $0x318] sm:$0xff]   ;;  %v7266_v17 = vmul.bf16 %v7063_v19, %v7063_v19  ;;  %v6257_v19 = vld [vmem:[%s7945_s1 + $0x320] sm:$0xff]  }
  0x6d   :  { %5662 = vmatprep.subr.bf16.mxu1 %v6208_v29  ;;  %1746 = vmatprep.mubr.bf16.mxu0 %v5085_v4  ;;  %v6254_v29 = vld [vmem:[%s7945_s1 + $0x398] sm:$0xff]   ;;  %v6275_v4 = vld [vmem:[%s7945_s1 + $0x440] sm:$0xff]  }
  0x6e   :  { %1787 = vmatprep.mubr.bf16.mxu1 %v5087_v5  ;;  %v5266_v16 = vcombine.low %v7248_v26, %v7252_v27  ;;  %v6276_v5 = vld [vmem:[%s7945_s1 + $0x4c0] sm:$0xff]  }
  0x6f   :  { %5641 = vmatpush3.bf16.msra.mxu0 %v6209_v30  ;;  %v5267_v30 = vcombine.high %v7248_v26, %v7252_v27 }
  0x70   :  { %5663 = vmatpush3.bf16.msra.mxu1 %v6210_v31  ;;  %5642 = vmatprep.subr.bf16.mxu0 %v6211_v32  ;;  %v7270_v31 = vmul.bf16 %v7068_v20, %v7068_v20  ;;  %v6255_v32 = vld [vmem:[%s7945_s1 + $0x360] sm:$0xff]  }
  0x71   :  { %5664 = vmatprep.subr.bf16.mxu1 %v6212_v33  ;;  %v6256_v33 = vld [vmem:[%s7945_s1 + $0x3e0] sm:$0xff]  }
  0x72   :  { %v5268_v20 = vcombine.low %v7266_v17, %v7270_v31 }
  0x73   :  { %5643 = vmatpush3.bf16.msra.mxu0 %v6213_v34  ;;  %v5269_v34 = vcombine.high %v7266_v17, %v7270_v31  ;;  %v5075_v17 = vld [vmem:[%s7947_s3] ss:$0 sm:$0xff]  ;;  %v6390_v31 = vld [vmem:[#allocation4 + $0x290] sm:$0xff]  }
  0x74   :  { %5665 = vmatpush3.bf16.msra.mxu1 %v6214_v35  ;;  %5644 = vmatprep.subr.bf16.mxu0 %v6215_v36  ;;  %v6258_v35 = vld [vmem:[%s7945_s1 + $0x3a0] sm:$0xff]   ;;  %v6259_v36 = vld [vmem:[%s7945_s1 + $0x368] sm:$0xff]  }
  0x75   :  { %5666 = vmatprep.subr.bf16.mxu1 %v6216_v39  ;;  %v6260_v39 = vld [vmem:[%s7945_s1 + $0x3e8] sm:$0xff]  }
  0x77   :  { %5645 = vmatpush3.bf16.msra.mxu0 %v6217_v40  ;;  %v6261_v40 = vld [vmem:[%s7945_s1 + $0x328] sm:$0xff]  }
  0x78   :  { %5667 = vmatpush3.bf16.msra.mxu1 %v6218_v43  ;;  %5646 = vmatprep.subr.bf16.mxu0 %v6219_v44  ;;  %v6262_v43 = vld [vmem:[%s7945_s1 + $0x3a8] sm:$0xff]   ;;  %v6263_v44 = vld [vmem:[%s7945_s1 + $0x370] sm:$0xff]  }
  0x79   :  { %5668 = vmatprep.subr.bf16.mxu1 %v6220_v46  ;;  %v6264_v46 = vld [vmem:[%s7945_s1 + $0x3f0] sm:$0xff]  }
  0x7b   :  { %5647 = vmatpush3.bf16.msra.mxu0 %v6221_v48  ;;  %v6265_v48 = vld [vmem:[%s7945_s1 + $0x330] sm:$0xff]  }
  0x7c   :  { %5669 = vmatpush3.bf16.msra.mxu1 %v6222_v51  ;;  %5648 = vmatprep.subr.bf16.mxu0 %v6223_v52  ;;  %v6266_v51 = vld [vmem:[%s7945_s1 + $0x3b0] sm:$0xff]   ;;  %v6267_v52 = vld [vmem:[%s7945_s1 + $0x378] sm:$0xff]  }
  0x7d   :  { %5670 = vmatprep.subr.bf16.mxu1 %v6224_v53  ;;  %v6268_v53 = vld [vmem:[%s7945_s1 + $0x3f8] sm:$0xff]  }
  0x7f   :  { %5649 = vmatpush3.bf16.msra.mxu0 %v6225_v54  ;;  %v6269_v54 = vld [vmem:[%s7945_s1 + $0x338] sm:$0xff]  }
  0x80   :  { %5671 = vmatpush3.bf16.msra.mxu1 %v6226_v55  ;;  %5650 = vmatprep.subr.bf16.mxu0 %v6227_v56  ;;  %v6270_v55 = vld [vmem:[%s7945_s1 + $0x3b8] sm:$0xff]   ;;  %v7327_v56 = vld [vmem:[%s7963_s29 + $0x30] sm:$0xff] }
  0x81   :  { %5672 = vmatprep.subr.bf16.mxu1 %v6228_v57  ;;  %v7332_v57 = vld [vmem:[%s7963_s29 + $0x84] sm:$0xff] }
  0x83   :  { %5651 = vmatpush3.bf16.msra.mxu0 %v6229_v58  ;;  %v7337_v58 = vld [vmem:[%s7963_s29 + $0x38] sm:$0xff] }
  0x84   :  { %5673 = vmatpush3.bf16.msra.mxu1 %v6230_v59  ;;  %5652 = vmatprep.subr.bf16.mxu0 %v6231_v60  ;;  %v5089_v59 = vcombine.high %v7327_v56, %v7332_v57  ;;  %v7344_v60 = vld [vmem:[%s7963_s29 + $0x8c] sm:$0xff] }
  0x85   :  { %5674 = vmatprep.subr.bf16.mxu1 %v6232_v61  ;;  %v5088_v61 = vcombine.low %v7327_v56, %v7332_v57 }
  0x87   :  { %5653 = vmatpush3.bf16.msra.mxu0 %v6233_v62  ;;  %v5091_v62 = vcombine.high %v7337_v58, %v7344_v60 }
  0x88   :  { %5675 = vmatpush3.bf16.msra.mxu1 %v6234_v63  ;;  %5682 = vmatprep.subr.bf16.mxu0 %v6239_v8  ;;  %v5090_v63 = vcombine.low %v7337_v58, %v7344_v60  ;;  %v6279_v8 = vld [vmem:[%s7945_s1 + $0x448] sm:$0xff]  }
  0x89   :  { %5704 = vmatprep.subr.bf16.mxu1 %v6240_v9  ;;  %v6280_v9 = vld [vmem:[%s7945_s1 + $0x4c8] sm:$0xff]  }
  0x8a   :  { %1747 = vmatmul.mubr.bf16.vlgmr.msra.gmra.mrb[8].mxu0 %v5084_v6  ;;  %v6277_v6 = vld [vmem:[%s7945_s1 + $0x400] sm:$0xff]  }
  0x8b   :  { %1788 = vmatmul.mubr.bf16.vlgmr.msra.gmra.mrb[8].mxu1 %v5086_v7  ;;  %5683 = vmatpush3.bf16.msra.mxu0 %v6241_v10  ;;  %v6278_v7 = vld [vmem:[%s7945_s1 + $0x480] sm:$0xff]   ;;  %v6281_v10 = vld [vmem:[%s7945_s1 + $0x408] sm:$0xff]  }
  0x8c   :  { %5705 = vmatpush3.bf16.msra.mxu1 %v6242_v11  ;;  %5684 = vmatprep.subr.bf16.mxu0 %v6243_v12  ;;  %v6282_v11 = vld [vmem:[%s7945_s1 + $0x488] sm:$0xff]   ;;  %v6283_v12 = vld [vmem:[%s7945_s1 + $0x450] sm:$0xff]  }
  0x8d   :  { %5706 = vmatprep.subr.bf16.mxu1 %v6244_v13  ;;  %1828 = vmatprep.mubr.bf16.mxu0 %v5089_v59  ;;  %v6284_v13 = vld [vmem:[%s7945_s1 + $0x4d0] sm:$0xff]   ;;  %v7475_v59 = vld [vmem:[%s7963_s29 + $0x40] sm:$0xff] }
  0x8e   :  { %1869 = vmatprep.mubr.bf16.mxu1 %v5091_v62 }
  0x8f   :  { %5685 = vmatpush3.bf16.msra.mxu0 %v6245_v14  ;;  %v6285_v14 = vld [vmem:[%s7945_s1 + $0x410] sm:$0xff]  }
  0x90   :  { %5707 = vmatpush3.bf16.msra.mxu1 %v6246_v15  ;;  %5686 = vmatprep.subr.bf16.mxu0 %v6247_v18  ;;  %v6286_v15 = vld [vmem:[%s7945_s1 + $0x490] sm:$0xff]   ;;  %v7390_v18 = vmul.bf16 %v7179_v0, %v7179_v0 }
  0x91   :  { %5708 = vmatprep.subr.bf16.mxu1 %v6248_v21  ;;  %v7394_v21 = vmul.bf16 %v7184_v1, %v7184_v1  ;;  %v7408_v1 = vmul.bf16 %v7189_v2, %v7189_v2  ;;  %v6291_v2 = vld [vmem:[%s7945_s1 + $0x460] sm:$0xff]  }
  0x93   :  { %5687 = vmatpush3.bf16.msra.mxu0 %v6249_v22  ;;  %v6287_v22 = vld [vmem:[%s7945_s1 + $0x458] sm:$0xff]   ;;  %v5270_v0 = vcombine.low %v7390_v18, %v7394_v21 }
  0x94   :  { %5709 = vmatpush3.bf16.msra.mxu1 %v6250_v23  ;;  %5688 = vmatprep.subr.bf16.mxu0 %v6251_v24  ;;  %v6288_v23 = vld [vmem:[%s7945_s1 + $0x4d8] sm:$0xff]   ;;  %v5271_v24 = vcombine.high %v7390_v18, %v7394_v21 }
  0x95   :  { %5710 = vmatprep.subr.bf16.mxu1 %v6252_v25  ;;  %v7412_v25 = vmul.bf16 %v7194_v3, %v7194_v3 }
  0x97   :  { %5689 = vmatpush3.bf16.msra.mxu0 %v6253_v28  ;;  %v6289_v28 = vld [vmem:[%s7945_s1 + $0x418] sm:$0xff]   ;;  %v5272_v3 = vcombine.low %v7408_v1, %v7412_v25 }
  0x98   :  { %5711 = vmatpush3.bf16.msra.mxu1 %v6254_v29  ;;  %5690 = vmatprep.subr.bf16.mxu0 %v6255_v32  ;;  %v6290_v29 = vld [vmem:[%s7945_s1 + $0x498] sm:$0xff]   ;;  %v5273_v32 = vcombine.high %v7408_v1, %v7412_v25  ;;  %v6416_v25 = vld [vmem:[#allocation4 + $0x308] sm:$0xff]  }
  0x99   :  { %5712 = vmatprep.subr.bf16.mxu1 %v6256_v33  ;;  %v6292_v33 = vld [vmem:[%s7945_s1 + $0x4e0] sm:$0xff]   ;;  %v6422_v1 = vld [vmem:[#allocation4 + $0x390] sm:$0xff]  }
  0x9b   :  { %5691 = vmatpush3.bf16.msra.mxu0 %v6257_v19  ;;  %v6293_v19 = vld [vmem:[%s7945_s1 + $0x420] sm:$0xff]  }
  0x9c   :  { %5713 = vmatpush3.bf16.msra.mxu1 %v6258_v35  ;;  %5692 = vmatprep.subr.bf16.mxu0 %v6259_v36  ;;  %v6294_v35 = vld [vmem:[%s7945_s1 + $0x4a0] sm:$0xff]   ;;  %v6295_v36 = vld [vmem:[%s7945_s1 + $0x468] sm:$0xff]  }
  0x9d   :  { %5714 = vmatprep.subr.bf16.mxu1 %v6260_v39  ;;  %v6296_v39 = vld [vmem:[%s7945_s1 + $0x4e8] sm:$0xff]  }
  0x9f   :  { %5693 = vmatpush3.bf16.msra.mxu0 %v6261_v40  ;;  %v6297_v40 = vld [vmem:[%s7945_s1 + $0x428] sm:$0xff]  }
  0xa0   :  { %5715 = vmatpush3.bf16.msra.mxu1 %v6262_v43  ;;  %5694 = vmatprep.subr.bf16.mxu0 %v6263_v44  ;;  %v6298_v43 = vld [vmem:[%s7945_s1 + $0x4a8] sm:$0xff]   ;;  %v6299_v44 = vld [vmem:[%s7945_s1 + $0x470] sm:$0xff]  }
  0xa1   :  { %5716 = vmatprep.subr.bf16.mxu1 %v6264_v46  ;;  %v6300_v46 = vld [vmem:[%s7945_s1 + $0x4f0] sm:$0xff]  }
  0xa3   :  { %5695 = vmatpush3.bf16.msra.mxu0 %v6265_v48  ;;  %v6301_v48 = vld [vmem:[%s7945_s1 + $0x430] sm:$0xff]  }
  0xa4   :  { %5717 = vmatpush3.bf16.msra.mxu1 %v6266_v51  ;;  %5696 = vmatprep.subr.bf16.mxu0 %v6267_v52  ;;  %v6302_v51 = vld [vmem:[%s7945_s1 + $0x4b0] sm:$0xff]   ;;  %v6303_v52 = vld [vmem:[%s7945_s1 + $0x478] sm:$0xff]  }
  0xa5   :  { %5718 = vmatprep.subr.bf16.mxu1 %v6268_v53  ;;  %v6304_v53 = vld [vmem:[%s7945_s1 + $0x4f8] sm:$0xff]  }
  0xa7   :  { %5697 = vmatpush3.bf16.msra.mxu0 %v6269_v54  ;;  %v6305_v54 = vld [vmem:[%s7945_s1 + $0x438] sm:$0xff]  }
  0xa8   :  { %5719 = vmatpush3.bf16.msra.mxu1 %v6270_v55  ;;  %5726 = vmatprep.subr.bf16.mxu0 %v6275_v4  ;;  %v6306_v55 = vld [vmem:[%s7945_s1 + $0x4b8] sm:$0xff]  }
  0xa9   :  { %5748 = vmatprep.subr.bf16.mxu1 %v6276_v5  ;;  %v7492_v4 = vld [vmem:[%s7963_s29 + $0x9c] sm:$0xff] }
  0xaa   :  { %1829 = vmatmul.mubr.bf16.vlgmr.msra.gmra.mrb[12].mxu0 %v5088_v61  ;;  %v7480_v61 = vld [vmem:[%s7963_s29 + $0x94] sm:$0xff] }
  0xab   :  { %1870 = vmatmul.mubr.bf16.vlgmr.msra.gmra.mrb[12].mxu1 %v5090_v63  ;;  %5727 = vmatpush3.bf16.msra.mxu0 %v6277_v6  ;;  %v5093_v62 = vcombine.high %v7475_v59, %v7480_v61  ;;  %v7487_v63 = vld [vmem:[%s7963_s29 + $0x48] sm:$0xff]  ;;  %v5092_v5 = vcombine.low %v7475_v59, %v7480_v61 }
  0xac   :  { %5749 = vmatpush3.bf16.msra.mxu1 %v6278_v7  ;;  %5728 = vmatprep.subr.bf16.mxu0 %v6279_v8  ;;  %v5095_v6 = vcombine.high %v7487_v63, %v7492_v4  ;;  %v5094_v7 = vcombine.low %v7487_v63, %v7492_v4  ;;  %v6311_v8 = vld [vmem:[%s7945_s1 + $0x500] sm:$0xff]  }
  0xad   :  { %5750 = vmatprep.subr.bf16.mxu1 %v6280_v9  ;;  %1910 = vmatprep.mubr.bf16.mxu0 %v5093_v62  ;;  %v6710_v9 = vmov 0.0   ;;  %v6328_v62 = vld [vmem:[#allocation4 + $0x18] sm:$0xff]  }
  0xae   :  { %1951 = vmatprep.mubr.bf16.mxu1 %v5095_v6  ;;  %v6337_v6 = vld [vmem:[#allocation4 + $0xe8] sm:$0xff]  }
  0xaf   :  { %5729 = vmatpush3.bf16.msra.mxu0 %v6281_v10  ;;  %v6312_v10 = vld [vmem:[%s7945_s1 + $0x508] sm:$0xff]  }
  0xb0   :  { %5751 = vmatpush3.bf16.msra.mxu1 %v6282_v11  ;;  %5730 = vmatprep.subr.bf16.mxu0 %v6283_v12  ;;  %v6313_v11 = vld [vmem:[%s7945_s1 + $0x510] ss:$0 sps:$4 sm:$0xff]   ;;  %v6317_v12 = vld [vmem:[#allocation4 + $0xc0] sm:$0xff]  }
  0xb1   :  { %5752 = vmatprep.subr.bf16.mxu1 %v6284_v13  ;;  %v7519_v13 = vld [vmem:[%s7963_s29 + $0x50] sm:$0xf] }
  0xb3   :  { %5731 = vmatpush3.bf16.msra.mxu0 %v6285_v14  ;;  %v6318_v14 = vld [vmem:[#allocation4 + $0x80] sm:$0xff]  }
  0xb4   :  { %5753 = vmatpush3.bf16.msra.mxu1 %v6286_v15  ;;  %5732 = vmatprep.subr.bf16.mxu0 %v6287_v22  ;;  %v6315_v15 = vld [vmem:[#allocation4 + $0x40] sm:$0xff]   ;;  %v1548_v22 = vsel %vm1546_vm1, %v6313_v11, 0  ;;  %v6342_v11 = vld [vmem:[#allocation4 + $0xb0] sm:$0xff]  }
  0xb5   :  { %5754 = vmatprep.subr.bf16.mxu1 %v6288_v23  ;;  %v6321_v23 = vld [vmem:[#allocation4 + $0xc8] sm:$0xff]  }
  0xb7   :  { %5733 = vmatpush3.bf16.msra.mxu0 %v6289_v28  ;;  %v6322_v28 = vld [vmem:[#allocation4 + $0x88] sm:$0xff]  }
  0xb8   :  { %5755 = vmatpush3.bf16.msra.mxu1 %v6290_v29  ;;  %5734 = vmatprep.subr.bf16.mxu0 %v6291_v2  ;;  %v7530_v29 = vmul.bf16 %v7327_v56, %v7327_v56  ;;  %v7534_v2 = vmul.bf16 %v7332_v57, %v7332_v57  ;;  %v6325_v57 = vld [vmem:[#allocation4 + $0xd0] sm:$0xff]  }
  0xb9   :  { %5756 = vmatprep.subr.bf16.mxu1 %v6292_v33 }
  0xba   :  { %v5274_v56 = vcombine.low %v7530_v29, %v7534_v2 }
  0xbb   :  { %5735 = vmatpush3.bf16.msra.mxu0 %v6293_v19  ;;  %v6316_v19 = vld [vmem:[#allocation4] sm:$0xff]  }
  0xbc   :  { %5757 = vmatpush3.bf16.msra.mxu1 %v6294_v35  ;;  %5736 = vmatprep.subr.bf16.mxu0 %v6295_v36  ;;  %v6319_v35 = vld [vmem:[#allocation4 + $0x48] sm:$0xff]   ;;  %v5275_v36 = vcombine.high %v7530_v29, %v7534_v2 }
  0xbd   :  { %5758 = vmatprep.subr.bf16.mxu1 %v6296_v39  ;;  %v7544_v39 = vmul.bf16 %v7337_v58, %v7337_v58  ;;  %v6323_v58 = vld [vmem:[#allocation4 + $0x50] sm:$0xff]  }
  0xbf   :  { %5737 = vmatpush3.bf16.msra.mxu0 %v6297_v40  ;;  %v7548_v40 = vmul.bf16 %v7344_v60, %v7344_v60  ;;  %v6330_v60 = vld [vmem:[#allocation4 + $0x98] sm:$0xff]  }
  0xc0   :  { %5759 = vmatpush3.bf16.msra.mxu1 %v6298_v43  ;;  %5738 = vmatprep.subr.bf16.mxu0 %v6299_v44  ;;  %v6326_v43 = vld [vmem:[#allocation4 + $0x90] sm:$0xff]   ;;  %v6320_v44 = vld [vmem:[#allocation4 + $0x8] sm:$0xff]  }
  0xc1   :  { %5760 = vmatprep.subr.bf16.mxu1 %v6300_v46  ;;  %v5277_v46 = vcombine.high %v7544_v39, %v7548_v40 }
  0xc3   :  { %5739 = vmatpush3.bf16.msra.mxu0 %v6301_v48  ;;  %v5276_v48 = vcombine.low %v7544_v39, %v7548_v40  ;;  %v6453_v39 = vld [vmem:[#allocation4 + $0x4d0] sm:$0xff]  }
  0xc4   :  { %5761 = vmatpush3.bf16.msra.mxu1 %v6302_v51  ;;  %5740 = vmatprep.subr.bf16.mxu0 %v6303_v52  ;;  %v6329_v51 = vld [vmem:[#allocation4 + $0xd8] sm:$0xff]   ;;  %v6324_v52 = vld [vmem:[#allocation4 + $0x10] sm:$0xff]  }
  0xc5   :  { %5762 = vmatprep.subr.bf16.mxu1 %v6304_v53  ;;  %v6327_v53 = vld [vmem:[#allocation4 + $0x58] sm:$0xff]   ;;  %v6454_v40 = vld [vmem:[#allocation4 + $0x490] sm:$0xff]  }
  0xc7   :  { %5741 = vmatpush3.bf16.msra.mxu0 %v6305_v54  ;;  %v6333_v54 = vld [vmem:[#allocation4 + $0xe0] sm:$0xff]  }
  0xc8   :  { %5763 = vmatpush3.bf16.msra.mxu1 %v6306_v55  ;;  %5796 = vmatprep.subr.bf16.mxu0 %v6317_v12  ;;  %v6334_v55 = vld [vmem:[#allocation4 + $0xa0] sm:$0xff]   ;;  %v6336_v12 = vld [vmem:[#allocation4 + $0x28] sm:$0xff]  }
  0xc9   :  { %6044 = vmatprep.subr.bf16.mxu1 %v6710_v9 }
  0xca   :  { %1911 = vmatmul.mubr.bf16.vlgmr.msra.gmra.mrb[16].mxu0 %v5092_v5  ;;  %v6331_v5 = vld [vmem:[#allocation4 + $0x60] sm:$0xff]  }
  0xcb   :  { %1952 = vmatmul.mubr.bf16.vlgmr.msra.gmra.mrb[16].mxu1 %v5094_v7  ;;  %3492 = vmatprep.mubr.bf16.mxu0 %v5265_v50  ;;  %v7524_v50 = vld [vmem:[%s7963_s29 + $0xa4] sm:$0xf]  ;;  %v6338_v7 = vld [vmem:[#allocation4 + $0xa8] sm:$0xff]  }
  0xcc   :  { %6045 = vmatpush3.bf16.msra.mxu1 %v6311_v8  ;;  %6050 = vmatprep.mubr.msk.bf16.mxu1 %vm6711_vm0, %v6710_v9  ;;  %v5096_v33 = vcombine.low %v7519_v13, %v7524_v50  ;;  %v6332_v8 = vld [vmem:[#allocation4 + $0x20] sm:$0xff]  }
  0xcd   :  { %6046 = vmatprep.subr.bf16.mxu1 %v6710_v9  ;;  %5797 = vmatpush3.bf16.msra.mxu0 %v6318_v14  ;;  %v6339_v14 = vld [vmem:[#allocation4 + $0x70] sm:$0xff]  }
  0xce   :  { %5798 = vmatprep.subr.bf16.mxu0 %v6321_v23  ;;  %v6340_v23 = vld [vmem:[#allocation4 + $0x30] sm:$0xff]  }
  0xd0   :  { %6047 = vmatpush3.bf16.msra.mxu1 %v6312_v10  ;;  %v6341_v10 = vld [vmem:[#allocation4 + $0xf0] sm:$0xff]  }
  0xd1   :  { %6048 = vmatprep.subr.bf16.mxu1 %v6710_v9  ;;  %5799 = vmatpush3.bf16.msra.mxu0 %v6322_v28  ;;  %v6343_v28 = vld [vmem:[#allocation4 + $0x78] sm:$0xff]  }
  0xd2   :  { %5800 = vmatprep.subr.bf16.mxu0 %v6325_v57  ;;  %v6347_v57 = vld [vmem:[#allocation4 + $0x140] sm:$0xff]  }
  0xd4   :  { %6049 = vmatpush3.bf16.msra.mxu1 %v1548_v22  ;;  %v6346_v22 = vld [vmem:[#allocation4 + $0xb8] sm:$0xff]  }
  0xd5   :  { %5774 = vmatprep.subr.bf16.mxu1 %v6315_v15  ;;  %5801 = vmatpush3.bf16.msra.mxu0 %v6326_v43  ;;  %v6345_v15 = vld [vmem:[#allocation4 + $0xf8] sm:$0xff]   ;;  %v6353_v43 = vld [vmem:[#allocation4 + $0x1c8] sm:$0xff]  }
  0xd6   :  { %5802 = vmatprep.subr.bf16.mxu0 %v6329_v51  ;;  %v7570_v51 = vmul.bf16 %v7480_v61, %v7480_v61  ;;  %v7582_v61 = vmul.bf16 %v7492_v4, %v7492_v4  ;;  %v6362_v4 = vld [vmem:[#allocation4 + $0x198] sm:$0xff]  }
  0xd7   :  { %6051 = vmatmul.mubr.msk.bf16.vlgmr.msra.gmra.mrb[20].mxu1 %vm1542_vm2, %v5096_v33  ;;  %v6349_v33 = vld [vmem:[#allocation4 + $0x1c0] sm:$0xff]  }
  0xd8   :  { %5775 = vmatpush3.bf16.msra.mxu1 %v6316_v19  ;;  %3451 = vmatprep.mubr.bf16.mxu1 %v5263_v45  ;;  %v6335_v45 = vld [vmem:[#allocation4 + $0x68] sm:$0xff]   ;;  %v6350_v19 = vld [vmem:[#allocation4 + $0x180] sm:$0xff]  }
  0xd9   :  { %5776 = vmatprep.subr.bf16.mxu1 %v6319_v35  ;;  %5803 = vmatpush3.bf16.msra.mxu0 %v6330_v60  ;;  %v6344_v35 = vld [vmem:[#allocation4 + $0x38] sm:$0xff]   ;;  %v7578_v60 = vmul.bf16 %v7487_v63, %v7487_v63 }
  0xda   :  { %5804 = vmatprep.subr.bf16.mxu0 %v6333_v54 }
  0xdb   :  { %v5281_v54 = vcombine.high %v7578_v60, %v7582_v61  ;;  %v5280_v63 = vcombine.low %v7578_v60, %v7582_v61 }
  0xdc   :  { %5777 = vmatpush3.bf16.msra.mxu1 %v6320_v44  ;;  %v6354_v44 = vld [vmem:[#allocation4 + $0x188] sm:$0xff]  }
  0xdd   :  { %5778 = vmatprep.subr.bf16.mxu1 %v6323_v58  ;;  %5805 = vmatpush3.bf16.msra.mxu0 %v6334_v55  ;;  %v7566_v58 = vmul.bf16 %v7475_v59, %v7475_v59  ;;  %v6357_v59 = vld [vmem:[#allocation4 + $0x1d0] sm:$0xff]  }
  0xde   :  { %5806 = vmatprep.subr.bf16.mxu0 %v6337_v6  ;;  %v6355_v55 = vld [vmem:[#allocation4 + $0x150] sm:$0xff]   ;;  %v6360_v6 = vld [vmem:[#allocation4 + $0x118] sm:$0xff]  }
  0xe0   :  { %5779 = vmatpush3.bf16.msra.mxu1 %v6324_v52  ;;  %v6358_v52 = vld [vmem:[#allocation4 + $0x190] sm:$0xff]  }
  0xe1   :  { %5780 = vmatprep.subr.bf16.mxu1 %v6327_v53  ;;  %5807 = vmatpush3.bf16.msra.mxu0 %v6338_v7  ;;  %v6352_v53 = vld [vmem:[#allocation4 + $0x108] sm:$0xff]   ;;  %v118_v7 = vmul.bf16 %v7519_v13, %v7519_v13 }
  0xe2   :  { %5808 = vmatprep.subr.bf16.mxu0 %v6341_v10  ;;  %v6368_v13 = vld [vmem:[#allocation4 + $0x128] sm:$0xff]  }
  0xe4   :  { %5781 = vmatpush3.bf16.msra.mxu1 %v6328_v62  ;;  %v6361_v62 = vld [vmem:[#allocation4 + $0x1d8] sm:$0xff]  }
  0xe5   :  { %5782 = vmatprep.subr.bf16.mxu1 %v6331_v5  ;;  %5809 = vmatpush3.bf16.msra.mxu0 %v6342_v11  ;;  %v6366_v5 = vld [vmem:[#allocation4 + $0x1a0] sm:$0xff]   ;;  %v6370_v11 = vld [vmem:[#allocation4 + $0x1a8] sm:$0xff]  }
  0xe6   :  { %5810 = vmatprep.subr.bf16.mxu0 %v6345_v15  ;;  %v6373_v15 = vld [vmem:[#allocation4 + $0x1f0] sm:$0xff]  }
  0xe8   :  { %5783 = vmatpush3.bf16.msra.mxu1 %v6332_v8  ;;  %v129_v8 = vmul.bf16 %v7524_v50, %v7524_v50  ;;  %v6371_v50 = vld [vmem:[#allocation4 + $0x170] sm:$0xff]  }
  0xe9   :  { %5784 = vmatprep.subr.bf16.mxu1 %v6335_v45  ;;  %5811 = vmatpush3.bf16.msra.mxu0 %v6346_v22  ;;  %v6363_v45 = vld [vmem:[#allocation4 + $0x160] sm:$0xff]   ;;  %v6374_v22 = vld [vmem:[#allocation4 + $0x1b0] sm:$0xff]  }
  0xea   :  { %5840 = vmatprep.subr.bf16.mxu0 %v6349_v33  ;;  %v7598_v10 = vcombine.low %v118_v7, %v129_v8  ;;  %v6372_v33 = vld [vmem:[#allocation4 + $0x130] sm:$0xff]   ;;  %v6394_v7 = vld [vmem:[#allocation4 + $0x298] sm:$0xff]  }
  0xec   :  { %5785 = vmatpush3.bf16.msra.mxu1 %v6336_v12  ;;  %3493 = vmatmul.mubr.bf16.vlgmr.msra.gmra.mrb[20].mxu0 %v5264_v49  ;;  %v5279_v49 = vcombine.high %v7566_v58, %v7570_v51  ;;  %v6364_v12 = vld [vmem:[#allocation4 + $0x120] sm:$0xff]  }
  0xed   :  { %5786 = vmatprep.subr.bf16.mxu1 %v6339_v14  ;;  %5841 = vmatpush3.bf16.msra.mxu0 %v6350_v19  ;;  %v6367_v14 = vld [vmem:[#allocation4 + $0x168] sm:$0xff]   ;;  %v6375_v19 = vld [vmem:[#allocation4 + $0x178] sm:$0xff]  }
  0xee   :  { %3574 = vmatprep.mubr.bf16.mxu0 %v5269_v34  ;;  %5842 = vmatprep.subr.bf16.mxu0 %v6353_v43  ;;  %v5278_v34 = vcombine.low %v7566_v58, %v7570_v51  ;;  %v6376_v43 = vld [vmem:[#allocation4 + $0x138] sm:$0xff]  }
  0xf0   :  { %5787 = vmatpush3.bf16.msra.mxu1 %v6340_v23  ;;  %v6377_v23 = vld [vmem:[#allocation4 + $0x1f8] sm:$0xff]  }
  0xf1   :  { %5788 = vmatprep.subr.bf16.mxu1 %v6343_v28  ;;  %5843 = vmatpush3.bf16.msra.mxu0 %v6354_v44  ;;  %v6378_v28 = vld [vmem:[#allocation4 + $0x1b8] sm:$0xff]   ;;  %v6379_v44 = vld [vmem:[#allocation4 + $0x240] sm:$0xff]  }
  0xf2   :  { %5844 = vmatprep.subr.bf16.mxu0 %v6357_v59  ;;  %v6380_v59 = vld [vmem:[#allocation4 + $0x200] sm:$0xff]  }
  0xf4   :  { %5789 = vmatpush3.bf16.msra.mxu1 %v6344_v35  ;;  %v6381_v35 = vld [vmem:[#allocation4 + $0x2c0] sm:$0xff]  }
  0xf5   :  { %5818 = vmatprep.subr.bf16.mxu1 %v6347_v57  ;;  %5845 = vmatpush3.bf16.msra.mxu0 %v6358_v52  ;;  %v6382_v57 = vld [vmem:[#allocation4 + $0x280] sm:$0xff]   ;;  %v6383_v52 = vld [vmem:[#allocation4 + $0x248] sm:$0xff]  }
  0xf6   :  { %5846 = vmatprep.subr.bf16.mxu0 %v6361_v62 }
  0xf7   :  { %3452 = vmatmul.mubr.bf16.vlgmr.msra.gmra.mrb[24].mxu1 %v5262_v47  ;;  %v6365_v47 = vld [vmem:[#allocation4 + $0x1e0] sm:$0xff]  }
  0xf8   :  { %5819 = vmatpush3.bf16.msra.mxu1 %v6348_v41  ;;  %3533 = vmatprep.mubr.bf16.mxu1 %v5267_v30  ;;  %v6369_v30 = vld [vmem:[#allocation4 + $0x1e8] sm:$0xff]  }
  0xf9   :  { %5820 = vmatprep.subr.bf16.mxu1 %v6351_v42  ;;  %5847 = vmatpush3.bf16.msra.mxu0 %v6362_v4  ;;  %v6385_v41 = vld [vmem:[#allocation4 + $0x2c8] sm:$0xff]   ;;  %v6387_v4 = vld [vmem:[#allocation4 + $0x250] sm:$0xff]  }
  0xfa   :  { %5848 = vmatprep.subr.bf16.mxu0 %v6365_v47  ;;  %v6386_v42 = vld [vmem:[#allocation4 + $0x288] sm:$0xff]  }
  0xfc   :  { %5821 = vmatpush3.bf16.msra.mxu1 %v6352_v53  ;;  %v6389_v53 = vld [vmem:[#allocation4 + $0x2d0] sm:$0xff]  }
  0xfd   :  { %5822 = vmatprep.subr.bf16.mxu1 %v6355_v55  ;;  %5849 = vmatpush3.bf16.msra.mxu0 %v6366_v5 }
  0xfe   :  { %5850 = vmatprep.subr.bf16.mxu0 %v6369_v30 }
 0x100   :  { %5823 = vmatpush3.bf16.msra.mxu1 %v6356_v37  ;;  %v6393_v37 = vld [vmem:[#allocation4 + $0x2d8] sm:$0xff]  }
 0x101   :  { %5824 = vmatprep.subr.bf16.mxu1 %v6359_v38  ;;  %5851 = vmatpush3.bf16.msra.mxu0 %v6370_v11  ;;  %v6391_v11 = vld [vmem:[#allocation4 + $0x258] sm:$0xff]  }
 0x102   :  { %5852 = vmatprep.subr.bf16.mxu0 %v6373_v15 }
 0x104   :  { %5825 = vmatpush3.bf16.msra.mxu1 %v6360_v6 }
 0x105   :  { %5826 = vmatprep.subr.bf16.mxu1 %v6363_v45  ;;  %5853 = vmatpush3.bf16.msra.mxu0 %v6374_v22  ;;  %v6397_v22 = vld [vmem:[#allocation4 + $0x2e0] sm:$0xff]  }
 0x106   :  { %5854 = vmatprep.subr.bf16.mxu0 %v6377_v23  ;;  %v6395_v23 = vld [vmem:[#allocation4 + $0x260] sm:$0xff]  }
 0x108   :  { %5827 = vmatpush3.bf16.msra.mxu1 %v6364_v12 }
 0x109   :  { %5828 = vmatprep.subr.bf16.mxu1 %v6367_v14  ;;  %5855 = vmatpush3.bf16.msra.mxu0 %v6378_v28  ;;  %v6401_v28 = vld [vmem:[#allocation4 + $0x2e8] sm:$0xff]  }
 0x10a   :  { %5884 = vmatprep.subr.bf16.mxu0 %v6381_v35  ;;  %v6399_v35 = vld [vmem:[#allocation4 + $0x268] sm:$0xff]  }
 0x10c   :  { %5829 = vmatpush3.bf16.msra.mxu1 %v6368_v13  ;;  %3575 = vmatmul.mubr.bf16.vlgmr.msra.gmra.mrb[24].mxu0 %v5268_v20  ;;  %v6384_v20 = vld [vmem:[#allocation4 + $0x208] sm:$0xff]   ;;  %v6398_v13 = vld [vmem:[#allocation4 + $0x2a0] sm:$0xff]  }
 0x10d   :  { %5830 = vmatprep.subr.bf16.mxu1 %v6371_v50  ;;  %5885 = vmatpush3.bf16.msra.mxu0 %v6382_v57  ;;  %v6392_v50 = vld [vmem:[#allocation4 + $0x218] sm:$0xff]   ;;  %v6405_v57 = vld [vmem:[#allocation4 + $0x2f0] sm:$0xff]  }
 0x10e   :  { %3656 = vmatprep.mubr.bf16.mxu0 %v5273_v32  ;;  %5886 = vmatprep.subr.bf16.mxu0 %v6385_v41  ;;  %v6403_v41 = vld [vmem:[#allocation4 + $0x270] sm:$0xff]  }
 0x110   :  { %5831 = vmatpush3.bf16.msra.mxu1 %v6372_v33  ;;  %v6402_v33 = vld [vmem:[#allocation4 + $0x2a8] sm:$0xff]  }
 0x111   :  { %5832 = vmatprep.subr.bf16.mxu1 %v6375_v19  ;;  %5887 = vmatpush3.bf16.msra.mxu0 %v6386_v42  ;;  %v6396_v19 = vld [vmem:[#allocation4 + $0x220] sm:$0xff]   ;;  %v6409_v42 = vld [vmem:[#allocation4 + $0x2f8] sm:$0xff]  }
 0x112   :  { %5888 = vmatprep.subr.bf16.mxu0 %v6389_v53  ;;  %v6407_v53 = vld [vmem:[#allocation4 + $0x278] sm:$0xff]  }
 0x114   :  { %5833 = vmatpush3.bf16.msra.mxu1 %v6376_v43  ;;  %v6406_v43 = vld [vmem:[#allocation4 + $0x2b0] sm:$0xff]  }
 0x115   :  { %5862 = vmatprep.subr.bf16.mxu1 %v6379_v44  ;;  %5889 = vmatpush3.bf16.msra.mxu0 %v6390_v31  ;;  %v6400_v44 = vld [vmem:[#allocation4 + $0x228] sm:$0xff]   ;;  %v6414_v31 = vld [vmem:[#allocation4 + $0x380] sm:$0xff]  }
 0x116   :  { %5890 = vmatprep.subr.bf16.mxu0 %v6393_v37  ;;  %v6415_v37 = vld [vmem:[#allocation4 + $0x348] sm:$0xff]  }
 0x117   :  { %3534 = vmatmul.mubr.bf16.vlgmr.msra.gmra.mrb[28].mxu1 %v5266_v16  ;;  %v6388_v16 = vld [vmem:[#allocation4 + $0x210] sm:$0xff]  }
 0x118   :  { %5863 = vmatpush3.bf16.msra.mxu1 %v6380_v59  ;;  %3615 = vmatprep.mubr.bf16.mxu1 %v5271_v24  ;;  %v6410_v59 = vld [vmem:[#allocation4 + $0x2b8] sm:$0xff]  }
 0x119   :  { %5864 = vmatprep.subr.bf16.mxu1 %v6383_v52  ;;  %5891 = vmatpush3.bf16.msra.mxu0 %v6394_v7  ;;  %v6404_v52 = vld [vmem:[#allocation4 + $0x230] sm:$0xff]  }
 0x11a   :  { %5892 = vmatprep.subr.bf16.mxu0 %v6397_v22 }
 0x11c   :  { %5865 = vmatpush3.bf16.msra.mxu1 %v6384_v20  ;;  %v6408_v20 = vld [vmem:[#allocation4 + $0x238] sm:$0xff]  }
 0x11d   :  { %v5566_v32 = vpop.f32.mrb[0].mxu0  ;;  %5866 = vmatprep.subr.bf16.mxu1 %v6387_v4  ;;  %5893 = vmatpush3.bf16.msra.mxu0 %v6398_v13  ;;  %v6412_v4 = vld [vmem:[#allocation4 + $0x300] sm:$0xff]  }
 0x11e   :  { %v5588_v55 = vpop.f32.mrb[0].mxu1  ;;  %v5567_v62 = vpop.f32.mrb[1].mxu0  ;;  %5894 = vmatprep.subr.bf16.mxu0 %v6401_v28 }
 0x11f   :  { %v5568_v38 = vadd.f32 %v5567_v62, %v5566_v32  ;;  %v5589_v47 = vpop.f32.mrb[1].mxu1  ;;  %v5569_v5 = vpop.f32.mrb[2].mxu0  ;;  %v6411_v32 = vld [vmem:[#allocation4 + $0x340] sm:$0xff]   ;;  %v6418_v62 = vld [vmem:[#allocation4 + $0x388] sm:$0xff]  }
 0x120   :  { %v5590_v26 = vadd.f32 %v5589_v47, %v5588_v55  ;;  %v5591_v27 = vpop.f32.mrb[2].mxu1  ;;  %v5570_v6 = vpop.f32.mrb[3].mxu0  ;;  %5867 = vmatpush3.bf16.msra.mxu1 %v6388_v16  ;;  %v6417_v55 = vld [vmem:[#allocation4 + $0x3c8] sm:$0xff]   ;;  %v6419_v47 = vld [vmem:[#allocation4 + $0x350] sm:$0xff]   ;;  %v6426_v16 = vld [vmem:[#allocation4 + $0x398] sm:$0xff]  }
 0x121   :  { %v1585_v8 = vadd.f32 %v5568_v38, %v5075_v17  ;;  %v5571_v45 = vadd.f32 %v5570_v6, %v5569_v5  ;;  %v5592_v30 = vpop.f32.mrb[3].mxu1  ;;  %5868 = vmatprep.subr.bf16.mxu1 %v6391_v11  ;;  %5895 = vmatpush3.bf16.msra.mxu0 %v6402_v33  ;;  %v6421_v38 = vld [vmem:[#allocation4 + $0x3d0] sm:$0xff]   ;;  %v6427_v33 = vld [vmem:[#allocation4 + $0x360] sm:$0xff]  }
 0x122   :  { %v5593_v12 = vadd.f32 %v5592_v30, %v5591_v27  ;;  %5896 = vmatprep.subr.bf16.mxu0 %v6405_v57  ;;  %v6425_v27 = vld [vmem:[#allocation4 + $0x3d8] sm:$0xff]   ;;  %v6431_v57 = vld [vmem:[#allocation4 + $0x368] sm:$0xff]  }
 0x123   :  { %v7615_v14 = vadd.f32 %v5590_v26, %v1585_v8  ;;  %v1588_v15 = vadd.f32 %v5571_v45, %v5075_v17  ;;  %v6413_v17 = vld [vmem:[#allocation4 + $0x3c0] sm:$0xff]   ;;  %v6420_v26 = vld [vmem:[#allocation4 + $0x310] sm:$0xff]  }
 0x124   :  { %5869 = vmatpush3.bf16.msra.mxu1 %v6392_v50  ;;  %v6429_v50 = vld [vmem:[#allocation4 + $0x3e0] sm:$0xff]  }
 0x125   :  { %v7617_v24 = vadd.f32 %v5593_v12, %v1588_v15  ;;  %5870 = vmatprep.subr.bf16.mxu1 %v6395_v23  ;;  %5897 = vmatpush3.bf16.msra.mxu0 %v6406_v43  ;;  %v6424_v15 = vld [vmem:[#allocation4 + $0x318] sm:$0xff]   ;;  %v6430_v23 = vld [vmem:[#allocation4 + $0x3a0] sm:$0xff]   ;;  %v6432_v43 = vld [vmem:[#allocation4 + $0x328] sm:$0xff]  }
 0x126   :  { %5898 = vmatprep.subr.bf16.mxu0 %v6409_v42  ;;  %v6436_v42 = vld [vmem:[#allocation4 + $0x330] sm:$0xff]  }
 0x128   :  { %5871 = vmatpush3.bf16.msra.mxu1 %v6396_v19  ;;  %v6433_v19 = vld [vmem:[#allocation4 + $0x3e8] sm:$0xff]  }
 0x129   :  { %5872 = vmatprep.subr.bf16.mxu1 %v6399_v35  ;;  %5899 = vmatpush3.bf16.msra.mxu0 %v6410_v59  ;;  %v6434_v35 = vld [vmem:[#allocation4 + $0x3a8] sm:$0xff]   ;;  %v6441_v59 = vld [vmem:[#allocation4 + $0x3f8] sm:$0xff]  }
 0x12a   :  { %5928 = vmatprep.subr.bf16.mxu0 %v6413_v17  ;;  %v6440_v17 = vld [vmem:[#allocation4 + $0x338] sm:$0xff]  }
 0x12c   :  { %5873 = vmatpush3.bf16.msra.mxu1 %v6400_v44  ;;  %3657 = vmatmul.mubr.bf16.vlgmr.msra.gmra.mrb[28].mxu0 %v5272_v3  ;;  %v6437_v44 = vld [vmem:[#allocation4 + $0x3f0] sm:$0xff]  }
 0x12d   :  { %5874 = vmatprep.subr.bf16.mxu1 %v6403_v41  ;;  %5929 = vmatpush3.bf16.msra.mxu0 %v6414_v31  ;;  %v6435_v41 = vld [vmem:[#allocation4 + $0x370] sm:$0xff]   ;;  %v6445_v31 = vld [vmem:[#allocation4 + $0x4c0] sm:$0xff]  }
 0x12e   :  { %3738 = vmatprep.mubr.bf16.mxu0 %v5277_v46  ;;  %5930 = vmatprep.subr.bf16.mxu0 %v6417_v55  ;;  %v6444_v55 = vld [vmem:[#allocation4 + $0x400] sm:$0xff]  }
 0x130   :  { %5875 = vmatpush3.bf16.msra.mxu1 %v6404_v52  ;;  %v6442_v52 = vld [vmem:[#allocation4 + $0x3b8] sm:$0xff]  }
 0x131   :  { %5876 = vmatprep.subr.bf16.mxu1 %v6407_v53  ;;  %5931 = vmatpush3.bf16.msra.mxu0 %v6418_v62  ;;  %v6439_v53 = vld [vmem:[#allocation4 + $0x378] sm:$0xff]   ;;  %v6449_v62 = vld [vmem:[#allocation4 + $0x4c8] sm:$0xff]  }
 0x132   :  { %5932 = vmatprep.subr.bf16.mxu0 %v6421_v38  ;;  %v6448_v38 = vld [vmem:[#allocation4 + $0x408] sm:$0xff]  }
 0x134   :  { %5877 = vmatpush3.bf16.msra.mxu1 %v6408_v20  ;;  %v6446_v20 = vld [vmem:[#allocation4 + $0x480] sm:$0xff]  }
 0x135   :  { %5906 = vmatprep.subr.bf16.mxu1 %v6411_v32  ;;  %5933 = vmatpush3.bf16.msra.mxu0 %v6422_v1  ;;  %v6443_v32 = vld [vmem:[#allocation4 + $0x440] sm:$0xff]  }
 0x136   :  { %5934 = vmatprep.subr.bf16.mxu0 %v6425_v27  ;;  %v6455_v27 = vld [vmem:[#allocation4 + $0x458] sm:$0xff]  }
 0x137   :  { %3616 = vmatmul.mubr.bf16.vlgmr.msra.gmra.mrb[32].mxu1 %v5270_v0 }
 0x138   :  { %5907 = vmatpush3.bf16.msra.mxu1 %v6412_v4  ;;  %3697 = vmatprep.mubr.bf16.mxu1 %v5275_v36  ;;  %v6423_v36 = vld [vmem:[#allocation4 + $0x358] sm:$0xff]   ;;  %v6450_v4 = vld [vmem:[#allocation4 + $0x488] sm:$0xff]  }
 0x139   :  { %5908 = vmatprep.subr.bf16.mxu1 %v6415_v37  ;;  %5935 = vmatpush3.bf16.msra.mxu0 %v6426_v16  ;;  %v6447_v37 = vld [vmem:[#allocation4 + $0x448] sm:$0xff]  }
 0x13a   :  { %5936 = vmatprep.subr.bf16.mxu0 %v6429_v50  ;;  %v6464_v50 = vld [vmem:[#allocation4 + $0x428] sm:$0xff]  }
 0x13c   :  { %5909 = vmatpush3.bf16.msra.mxu1 %v6416_v25 }
 0x13d   :  { %v5610_v3 = vpop.f32.mrb[4].mxu0  ;;  %5910 = vmatprep.subr.bf16.mxu1 %v6419_v47  ;;  %5937 = vmatpush3.bf16.msra.mxu0 %v6430_v23  ;;  %v6458_v47 = vld [vmem:[#allocation4 + $0x498] sm:$0xff]   ;;  %v6469_v23 = vld [vmem:[#allocation4 + $0x4f0] sm:$0xff]  }
 0x13e   :  { %v5632_v46 = vpop.f32.mrb[4].mxu1  ;;  %v5611_v5 = vpop.f32.mrb[5].mxu0  ;;  %5938 = vmatprep.subr.bf16.mxu0 %v6433_v19  ;;  %v6473_v19 = vld [vmem:[#allocation4 + $0x4f8] sm:$0xff]  }
 0x13f   :  { %v5612_v6 = vadd.f32 %v5611_v5, %v5610_v3  ;;  %v5633_v18 = vpop.f32.mrb[5].mxu1  ;;  %v5613_v21 = vpop.f32.mrb[6].mxu0  ;;  %v6457_v3 = vld [vmem:[#allocation4 + $0x4d8] sm:$0xff]  }
 0x140   :  { %v5634_v0 = vadd.f32 %v5633_v18, %v5632_v46  ;;  %v5635_v7 = vpop.f32.mrb[6].mxu1  ;;  %v5614_v8 = vpop.f32.mrb[7].mxu0  ;;  %5911 = vmatpush3.bf16.msra.mxu1 %v6420_v26 }
 0x141   :  { %v1667_v45 = vadd.f32 %v5612_v6, %v7615_v14  ;;  %v5615_v30 = vadd.f32 %v5614_v8, %v5613_v21  ;;  %v5636_v11 = vpop.f32.mrb[7].mxu1  ;;  %5912 = vmatprep.subr.bf16.mxu1 %v6423_v36  ;;  %v6428_v14 = vld [vmem:[#allocation4 + $0x320] sm:$0xff]   ;;  %5939 = vmatpush3.bf16.msra.mxu0 %v6434_v35  ;;  %v6456_v6 = vld [vmem:[#allocation4 + $0x418] sm:$0xff]  }
 0x142   :  { %v5637_v12 = vadd.f32 %v5636_v11, %v5635_v7  ;;  %5940 = vmatprep.subr.bf16.mxu0 %v6437_v44  ;;  %v6461_v7 = vld [vmem:[#allocation4 + $0x4e0] sm:$0xff]   ;;  %v6474_v35 = vld [vmem:[#allocation4 + $0x4b8] sm:$0xff]  }
 0x143   :  { %v7632_v22 = vadd.f32 %v5634_v0, %v1667_v45  ;;  %v1670_v13 = vadd.f32 %v5615_v30, %v7617_v24  ;;  %v6438_v24 = vld [vmem:[#allocation4 + $0x3b0] sm:$0xff]   ;;  %v6462_v8 = vld [vmem:[#allocation4 + $0x4a0] sm:$0xff]  }
 0x144   :  { %5913 = vmatpush3.bf16.msra.mxu1 %v6424_v15  ;;  %v6459_v11 = vld [vmem:[#allocation4 + $0x460] sm:$0xff]   ;;  %v6465_v15 = vld [vmem:[#allocation4 + $0x4e8] sm:$0xff]  }
 0x145   :  { %v7635_v28 = vadd.f32 %v5637_v12, %v1670_v13  ;;  %5914 = vmatprep.subr.bf16.mxu1 %v6427_v33  ;;  %5941 = vmatpush3.bf16.msra.mxu0 %v6438_v24  ;;  %v6460_v36 = vld [vmem:[#allocation4 + $0x420] sm:$0xff]   ;;  %v6466_v13 = vld [vmem:[#allocation4 + $0x4a8] sm:$0xff]   ;;  %v6470_v33 = vld [vmem:[#allocation4 + $0x4b0] sm:$0xff]  }
 0x146   :  { %5942 = vmatprep.subr.bf16.mxu0 %v6441_v59  ;;  %v6475_v44 = vld [vmem:[#allocation4 + $0x500] sm:$0xff]   ;;  %v6476_v24 = vld [vmem:[#allocation4 + $0x508] sm:$0xff]  }
 0x148   :  { %5915 = vmatpush3.bf16.msra.mxu1 %v6428_v14  ;;  %v6467_v14 = vld [vmem:[#allocation4 + $0x470] sm:$0xff]  }
 0x149   :  { %5916 = vmatprep.subr.bf16.mxu1 %v6431_v57  ;;  %5943 = vmatpush3.bf16.msra.mxu0 %v6442_v52  ;;  %v6471_v57 = vld [vmem:[#allocation4 + $0x478] sm:$0xff]  }
 0x14a   :  { %5972 = vmatprep.subr.bf16.mxu0 %v6445_v31 }
 0x14c   :  { %5917 = vmatpush3.bf16.msra.mxu1 %v6432_v43  ;;  %3739 = vmatmul.mubr.bf16.vlgmr.msra.gmra.mrb[32].mxu0 %v5276_v48  ;;  %v6451_v48 = vld [vmem:[#allocation4 + $0x450] sm:$0xff]   ;;  %v6472_v43 = vld [vmem:[#allocation4 + $0x438] sm:$0xff]  }
 0x14d   :  { %5918 = vmatprep.subr.bf16.mxu1 %v6435_v41  ;;  %3820 = vmatprep.mubr.bf16.mxu0 %v5281_v54  ;;  %v6452_v54 = vld [vmem:[#allocation4 + $0x410] sm:$0xff]  }
 0x14e   :  { %5973 = vmatpush3.bf16.msra.mxu0 %v6446_v20  ;;  %v6477_v41 = vld [vmem:[#allocation4 + $0x510] ss:$0 sps:$4 sm:$0xff]  }
 0x14f   :  { %5974 = vmatprep.subr.bf16.mxu0 %v6449_v62  ;;  %v3417_v61 = vsel %vm1546_vm1, %v6477_v41, 0  ;;  %v6489_v41 = vld [vmem:[%s7949_s5 + $0x34] ss:$8 sps:$4 sm:$0xff]  }
 0x150   :  { %5919 = vmatpush3.bf16.msra.mxu1 %v6436_v42 }
 0x151   :  { %5920 = vmatprep.subr.bf16.mxu1 %v6439_v53 }
 0x152   :  { %5975 = vmatpush3.bf16.msra.mxu0 %v6450_v4 }
 0x153   :  { %5976 = vmatprep.subr.bf16.mxu0 %v6453_v39 }
 0x154   :  { %5921 = vmatpush3.bf16.msra.mxu1 %v6440_v17 }
 0x155   :  { %5950 = vmatprep.subr.bf16.mxu1 %v6443_v32 }
 0x156   :  { %5977 = vmatpush3.bf16.msra.mxu0 %v6454_v40 }
 0x157   :  { %3698 = vmatmul.mubr.bf16.vlgmr.msra.gmra.mrb[36].mxu1 %v5274_v56  ;;  %5978 = vmatprep.subr.bf16.mxu0 %v6457_v3 }
 0x158   :  { %5951 = vmatpush3.bf16.msra.mxu1 %v6444_v55  ;;  %3779 = vmatprep.mubr.bf16.mxu1 %v5279_v49 }
 0x159   :  { %5952 = vmatprep.subr.bf16.mxu1 %v6447_v37 }
 0x15a   :  { %5979 = vmatpush3.bf16.msra.mxu0 %v6458_v47 }
 0x15b   :  { %5980 = vmatprep.subr.bf16.mxu0 %v6461_v7 }
 0x15c   :  { %5953 = vmatpush3.bf16.msra.mxu1 %v6448_v38 }
 0x15d   :  { %v5654_v1 = vpop.f32.mrb[8].mxu0  ;;  %5954 = vmatprep.subr.bf16.mxu1 %v6451_v48 }
 0x15e   :  { %v5676_v25 = vpop.f32.mrb[8].mxu1  ;;  %v5655_v29 = vpop.f32.mrb[9].mxu0  ;;  %5981 = vmatpush3.bf16.msra.mxu0 %v6462_v8 }
 0x15f   :  { %v5677_v2 = vpop.f32.mrb[9].mxu1  ;;  %v5656_v56 = vadd.f32 %v5655_v29, %v5654_v1  ;;  %v5657_v5 = vpop.f32.mrb[10].mxu0  ;;  %5982 = vmatprep.subr.bf16.mxu0 %v6465_v15 }
 0x160   :  { %v5678_v46 = vadd.f32 %v5677_v2, %v5676_v25  ;;  %v5679_v26 = vpop.f32.mrb[10].mxu1  ;;  %v5658_v49 = vpop.f32.mrb[11].mxu0  ;;  %5955 = vmatpush3.bf16.msra.mxu1 %v6452_v54 }
 0x161   :  { %v5680_v16 = vpop.f32.mrb[11].mxu1  ;;  %v1749_v18 = vadd.f32 %v5656_v56, %v7632_v22  ;;  %v5659_v21 = vadd.f32 %v5658_v49, %v5657_v5  ;;  %5956 = vmatprep.subr.bf16.mxu1 %v6455_v27  ;;  %v6463_v22 = vld [vmem:[#allocation4 + $0x468] sm:$0xff]  }
 0x162   :  { %v5681_v0 = vadd.f32 %v5680_v16, %v5679_v26  ;;  %5983 = vmatpush3.bf16.msra.mxu0 %v6466_v13 }
 0x163   :  { %v1790_v45 = vadd.f32 %v5678_v46, %v1749_v18  ;;  %v1752_v30 = vadd.f32 %v5659_v21, %v7635_v28  ;;  %5984 = vmatprep.subr.bf16.mxu0 %v6469_v23  ;;  %v6468_v28 = vld [vmem:[#allocation4 + $0x430] sm:$0xff]  }
 0x164   :  { %5957 = vmatpush3.bf16.msra.mxu1 %v6456_v6 }
 0x165   :  { %v1793_v12 = vadd.f32 %v5681_v0, %v1752_v30  ;;  %5958 = vmatprep.subr.bf16.mxu1 %v6459_v11 }
 0x166   :  { %5985 = vmatpush3.bf16.msra.mxu0 %v6470_v33  ;;  %v6480_v33 = vld [vmem:[%s7949_s5 + $0x4] ss:$8 sps:$4 sm:$0xff]  }
 0x167   :  { %5986 = vmatprep.subr.bf16.mxu0 %v6473_v19 }
 0x168   :  { %5959 = vmatpush3.bf16.msra.mxu1 %v6460_v36  ;;  %v5261_v36 = vld [vmem:[%s7948_s4] ss:$0 sm:$0xff] }
 0x169   :  { %5960 = vmatprep.subr.bf16.mxu1 %v6463_v22 }
 0x16a   :  { %5987 = vmatpush3.bf16.msra.mxu0 %v6474_v35  ;;  %v6483_v35 = vld [vmem:[%s7949_s5 + $0x14] ss:$8 sps:$4 sm:$0xff]  }
 0x16b   :  { %4217 = vmatprep.subr.bf16.mxu0 %v6480_v33 }
 0x16c   :  { %5961 = vmatpush3.bf16.msra.mxu1 %v6464_v50 }
 0x16d   :  { %5962 = vmatprep.subr.bf16.mxu1 %v6467_v14  ;;  %3821 = vmatmul.mubr.bf16.vlgmr.msra.gmra.mrb[36].mxu0 %v5280_v63  ;;  %v6478_v14 = vld [vmem:[%s7949_s5] ss:$8 sps:$4 sm:$0xff]  }
 0x16e   :  { %4218 = vmatpush1.bf16.msra.mxu0 %v6478_v14 }
 0x16f   :  { %4219 = vmatprep.subr.bf16.mxu0 %v6483_v35 }
 0x170   :  { %5963 = vmatpush3.bf16.msra.mxu1 %v6468_v28 }
 0x171   :  { %5964 = vmatprep.subr.bf16.mxu1 %v6471_v57  ;;  %v6481_v57 = vld [vmem:[%s7949_s5 + $0x10] ss:$8 sps:$4 sm:$0xff]  }
 0x172   :  { %4220 = vmatpush1.bf16.msra.mxu0 %v6481_v57 }
 0x174   :  { %5965 = vmatpush3.bf16.msra.mxu1 %v6472_v43 }
 0x175   :  { %6054 = vmatprep.subr.bf16.mxu1 %v6710_v9 }
 0x177   :  { %3780 = vmatmul.mubr.bf16.vlgmr.msra.gmra.mrb[40].mxu1 %v5278_v34 }
 0x178   :  { %6055 = vmatpush3.bf16.msra.mxu1 %v6475_v44  ;;  %6060 = vmatprep.mubr.msk.bf16.mxu1 %vm6711_vm0, %v6710_v9  ;;  %v6486_v44 = vld [vmem:[%s7949_s5 + $0x24] ss:$8 sps:$4 sm:$0xff]  }
 0x179   :  { %6056 = vmatprep.subr.bf16.mxu1 %v6710_v9  ;;  %4221 = vmatprep.subr.bf16.mxu0 %v6486_v44 }
 0x17c   :  { %6057 = vmatpush3.bf16.msra.mxu1 %v6476_v24  ;;  %v6484_v24 = vld [vmem:[%s7949_s5 + $0x20] ss:$8 sps:$4 sm:$0xff]  }
 0x17d   :  { %v5698_v42 = vpop.f32.mrb[12].mxu0  ;;  %6058 = vmatprep.subr.bf16.mxu1 %v6710_v9  ;;  %4222 = vmatpush1.bf16.msra.mxu0 %v6484_v24 }
 0x17e   :  { %v5720_v59 = vpop.f32.mrb[12].mxu1  ;;  %v5699_v60 = vpop.f32.mrb[13].mxu0  ;;  %4223 = vmatprep.subr.bf16.mxu0 %v6489_v41 }
 0x17f   :  { %v5700_v63 = vadd.f32 %v5699_v60, %v5698_v42  ;;  %v5721_v52 = vpop.f32.mrb[13].mxu1  ;;  %v5701_v53 = vpop.f32.mrb[14].mxu0  ;;  %v6487_v42 = vld [vmem:[%s7949_s5 + $0x30] ss:$8 sps:$4 sm:$0xff]   ;;  %v6490_v60 = vld [vmem:[%s7949_s5 + $0x40] ss:$8 sps:$4 sm:$0xff]  }
 0x180   :  { %v5722_v58 = vadd.f32 %v5721_v52, %v5720_v59  ;;  %v5723_v51 = vpop.f32.mrb[14].mxu1  ;;  %v5702_v34 = vpop.f32.mrb[15].mxu0  ;;  %6059 = vmatpush3.bf16.msra.mxu1 %v3417_v61  ;;  %v6492_v59 = vld [vmem:[%s7949_s5 + $0x44] ss:$8 sps:$4 sm:$0xff]   ;;  %v6495_v52 = vld [vmem:[%s7949_s5 + $0x54] ss:$8 sps:$4 sm:$0xff]  }
 0x181   :  { %v1831_v17 = vadd.f32 %v5700_v63, %v1790_v45  ;;  %v5703_v31 = vadd.f32 %v5702_v34, %v5701_v53  ;;  %v5724_v20 = vpop.f32.mrb[15].mxu1  ;;  %4224 = vmatpush1.bf16.msra.mxu0 %v6487_v42 }
 0x182   :  { %v5725_v32 = vadd.f32 %v5724_v20, %v5723_v51  ;;  %4225 = vmatprep.subr.bf16.mxu0 %v6492_v59  ;;  %v6493_v51 = vld [vmem:[%s7949_s5 + $0x50] ss:$8 sps:$4 sm:$0xff]   ;;  %v6496_v20 = vld [vmem:[%s7949_s5 + $0x60] ss:$8 sps:$4 sm:$0xff]  }
 0x183   :  { %v1872_v55 = vadd.f32 %v5722_v58, %v1831_v17  ;;  %v1834_v62 = vadd.f32 %v5703_v31, %v1793_v12  ;;  %6061 = vmatmul.mubr.msk.bf16.vlgmr.msra.gmra.mrb[44].mxu1 %vm1542_vm2, %v7598_v10  ;;  %v6498_v31 = vld [vmem:[%s7949_s5 + $0x64] ss:$8 sps:$4 sm:$0xff]  }
 0x185   :  { %v1875_v4 = vadd.f32 %v5725_v32, %v1834_v62  ;;  %4226 = vmatpush1.bf16.msra.mxu0 %v6490_v60  ;;  %v6501_v62 = vld [vmem:[%s7949_s5 + $0x74] ss:$8 sps:$4 sm:$0xff]  }
 0x186   :  { %4227 = vmatprep.subr.bf16.mxu0 %v6495_v52 }
 0x189   :  { %4228 = vmatpush1.bf16.msra.mxu0 %v6493_v51 }
 0x18a   :  { %4229 = vmatprep.subr.bf16.mxu0 %v6498_v31 }
 0x18d   :  { %4230 = vmatpush1.bf16.msra.mxu0 %v6496_v20 }
 0x18e   :  { %4231 = vmatprep.subr.bf16.mxu0 %v6501_v62 }
 0x19d   :  { %v5742_v37 = vpop.f32.mrb[16].mxu0 }
 0x19e   :  { %v5764_v38 = vpop.f32.mrb[16].mxu1  ;;  %v5743_v39 = vpop.f32.mrb[17].mxu0 }
 0x19f   :  { %v5744_v40 = vadd.f32 %v5743_v39, %v5742_v37  ;;  %v5765_v48 = vpop.f32.mrb[17].mxu1  ;;  %v5745_v54 = vpop.f32.mrb[18].mxu0 }
 0x1a0   :  { %v5766_v1 = vadd.f32 %v5765_v48, %v5764_v38  ;;  %v5767_v25 = vpop.f32.mrb[18].mxu1  ;;  %v5746_v3 = vpop.f32.mrb[19].mxu0  ;;  %v6499_v38 = vld [vmem:[%s7949_s5 + $0x70] ss:$8 sps:$4 sm:$0xff]  }
 0x1a1   :  { %v1913_v47 = vadd.f32 %v5744_v40, %v1872_v55  ;;  %v5747_v29 = vadd.f32 %v5746_v3, %v5745_v54  ;;  %v5768_v2 = vpop.f32.mrb[19].mxu1  ;;  %4232 = vmatpush1.bf16.msra.mxu0 %v6499_v38  ;;  %v6504_v54 = vld [vmem:[%s7949_s5 + $0x84] ss:$8 sps:$4 sm:$0xff]   ;;  %v6502_v3 = vld [vmem:[%s7949_s5 + $0x80] ss:$8 sps:$4 sm:$0xff]  }
 0x1a2   :  { %v5769_v56 = vadd.f32 %v5768_v2, %v5767_v25  ;;  %4233 = vmatprep.subr.bf16.mxu0 %v6504_v54  ;;  %v6505_v2 = vld [vmem:[%s7949_s5 + $0x90] ss:$8 sps:$4 sm:$0xff]  }
 0x1a3   :  { %v1916_v46 = vadd.f32 %v5747_v29, %v1875_v4  ;;  %v1954_v5 = vadd.f32 %v5766_v1, %v1913_v47  ;;  %v6507_v29 = vld [vmem:[%s7949_s5 + $0x94] ss:$8 sps:$4 sm:$0xff]  }
 0x1a5   :  { %v1957_v26 = vadd.f32 %v5769_v56, %v1916_v46  ;;  %4234 = vmatpush1.bf16.msra.mxu0 %v6502_v3  ;;  %v6510_v56 = vld [vmem:[%s7949_s5 + $0xa4] ss:$8 sps:$4 sm:$0xff]   ;;  %v6508_v46 = vld [vmem:[%s7949_s5 + $0xa0] ss:$8 sps:$4 sm:$0xff]  }
 0x1a6   :  { %4235 = vmatprep.subr.bf16.mxu0 %v6507_v29 }
 0x1a9   :  { %4236 = vmatpush1.bf16.msra.mxu0 %v6505_v2 }
 0x1aa   :  { %v1994_v27 = vpop.f32.mrb[20].mxu1  ;;  %4237 = vmatprep.subr.bf16.mxu0 %v6510_v56 }
 0x1ab   :  { %v7665_v49 = vadd.f32 %v1994_v27, %v1954_v5  ;;  %v6052_v10 = vpop.f32.mrb[21].mxu1  ;;  %v6513_v5 = vld [vmem:[%s7949_s5 + $0xb4] ss:$8 sps:$4 sm:$0xff]   ;;  %v6516_v27 = vld [vmem:[%s7949_s5 + $0xc4] ss:$8 sps:$4 sm:$0xff]  }
 0x1ac   :  { %v1997_v16 = vpop.f32.mrb[22].mxu1  ;;  %v6514_v10 = vld [vmem:[%s7949_s5 + $0xc0] ss:$8 sps:$4 sm:$0xff]  }
 0x1ad   :  { %v7667_v6 = vadd.f32 %v1997_v16, %v1957_v26  ;;  %v6053_v18 = vpop.f32.mrb[23].mxu1  ;;  %4238 = vmatpush1.bf16.msra.mxu0 %v6508_v46  ;;  %v6511_v26 = vld [vmem:[%s7949_s5 + $0xb0] ss:$8 sps:$4 sm:$0xff]  }
 0x1ae   :  { %4239 = vmatprep.subr.bf16.mxu0 %v6513_v5  ;;  %v6519_v18 = vld [vmem:[%s7949_s5 + $0xd4] ss:$8 sps:$4 sm:$0xff]  }
 0x1b1   :  { %4240 = vmatpush1.bf16.msra.mxu0 %v6511_v26 }
 0x1b2   :  { %4241 = vmatprep.subr.bf16.mxu0 %v6516_v27 }
 0x1b5   :  { %4242 = vmatpush1.bf16.msra.mxu0 %v6514_v10  ;;  %v3908_v10 = vmul.f32 %v7665_v49, %v7665_v49 }
 0x1b6   :  { %4243 = vmatprep.subr.bf16.mxu0 %v6519_v18 }
 0x1bf   :  { %v5812_v21 = vpop.f32.mrb[20].mxu0 }
 0x1c0   :  { %v5813_v0 = vpop.f32.mrb[21].mxu0 }
 0x1c1   :  { %v5814_v7 = vadd.f32 %v5813_v0, %v5812_v21  ;;  %v5815_v8 = vpop.f32.mrb[22].mxu0  ;;  %v6517_v0 = vld [vmem:[%s7949_s5 + $0xd0] ss:$8 sps:$4 sm:$0xff]  }
 0x1c2   :  { %v5816_v45 = vpop.f32.mrb[23].mxu0  ;;  %4244 = vmatpush1.bf16.msra.mxu0 %v6517_v0 }
 0x1c3   :  { %v5817_v30 = vadd.f32 %v5816_v45, %v5815_v8 }
 0x1ca   :  { %v5790_v11 = vpop.f32.mrb[24].mxu1 }
 0x1cb   :  { %v5791_v12 = vpop.f32.mrb[25].mxu1 }
 0x1cc   :  { %v5792_v15 = vadd.f32 %v5791_v12, %v5790_v11  ;;  %v5793_v13 = vpop.f32.mrb[26].mxu1  ;;  %v6522_v11 = vld [vmem:[%s7949_s5 + $0xe4] ss:$8 sps:$4 sm:$0xff]   ;;  %v6525_v12 = vld [vmem:[%s7949_s5 + $0xf4] ss:$8 sps:$4 sm:$0xff]  }
 0x1cd   :  { %v5794_v22 = vpop.f32.mrb[27].mxu1  ;;  %4245 = vmatprep.subr.bf16.mxu0 %v6522_v11 }
 0x1ce   :  { %v3454_v50 = vadd.f32 %v5792_v15, %v5261_v36  ;;  %v5795_v23 = vadd.f32 %v5794_v22, %v5793_v13  ;;  %v6523_v13 = vld [vmem:[%s7949_s5 + $0xf0] ss:$8 sps:$4 sm:$0xff]  }
 0x1d0   :  { %v3457_v28 = vadd.f32 %v5795_v23, %v5261_v36  ;;  %v3495_v19 = vadd.f32 %v5814_v7, %v3454_v50  ;;  %v6520_v36 = vld [vmem:[%s7949_s5 + $0xe0] ss:$8 sps:$4 sm:$0xff]  }
 0x1d1   :  { %4246 = vmatpush1.bf16.msra.mxu0 %v6520_v36 }
 0x1d2   :  { %v3498_v43 = vadd.f32 %v5817_v30, %v3457_v28  ;;  %4247 = vmatprep.subr.bf16.mxu0 %v6525_v12 }
 0x1d5   :  { %4248 = vmatpush1.bf16.msra.mxu0 %v6523_v13 }
 0x1df   :  { %v5856_v61 = vpop.f32.mrb[24].mxu0 }
 0x1e0   :  { %v5857_v63 = vpop.f32.mrb[25].mxu0 }
 0x1e1   :  { %v5858_v53 = vadd.f32 %v5857_v63, %v5856_v61  ;;  %v5859_v58 = vpop.f32.mrb[26].mxu0 }
 0x1e2   :  { %v5860_v34 = vpop.f32.mrb[27].mxu0 }
 0x1e3   :  { %v5861_v17 = vadd.f32 %v5860_v34, %v5859_v58 }
 0x1ea   :  { %v5834_v32 = vpop.f32.mrb[28].mxu1 }
 0x1eb   :  { %v5835_v55 = vpop.f32.mrb[29].mxu1 }
 0x1ec   :  { %v5836_v4 = vadd.f32 %v5835_v55, %v5834_v32  ;;  %v5837_v37 = vpop.f32.mrb[30].mxu1 }
 0x1ed   :  { %v5838_v39 = vpop.f32.mrb[31].mxu1 }
 0x1ee   :  { %v3536_v40 = vadd.f32 %v5836_v4, %v3495_v19  ;;  %v5839_v48 = vadd.f32 %v5838_v39, %v5837_v37  ;;  %v6528_v19 = vld [vmem:[%s7949_s5 + $0x104] ss:$8 sps:$4 sm:$0xff]  }
 0x1ef   :  { %4260 = vmatprep.subr.bf16.mxu0 %v6528_v19 }
 0x1f0   :  { %v3539_v1 = vadd.f32 %v5839_v48, %v3498_v43  ;;  %v3577_v25 = vadd.f32 %v5858_v53, %v3536_v40 }
 0x1f2   :  { %v3580_v47 = vadd.f32 %v5861_v17, %v3539_v1 }
 0x1ff   :  { %v5900_v16 = vpop.f32.mrb[28].mxu0 }
 0x200   :  { %v5901_v21 = vpop.f32.mrb[29].mxu0 }
 0x201   :  { %v5902_v7 = vadd.f32 %v5901_v21, %v5900_v16  ;;  %v5903_v8 = vpop.f32.mrb[30].mxu0 }
 0x202   :  { %v5904_v45 = vpop.f32.mrb[31].mxu0 }
 0x203   :  { %v5905_v30 = vadd.f32 %v5904_v45, %v5903_v8 }
 0x20a   :  { %v5878_v15 = vpop.f32.mrb[32].mxu1 }
 0x20b   :  { %v5879_v22 = vpop.f32.mrb[33].mxu1 }
 0x20c   :  { %v5880_v50 = vadd.f32 %v5879_v22, %v5878_v15  ;;  %v5881_v23 = vpop.f32.mrb[34].mxu1 }
 0x20d   :  { %v5882_v33 = vpop.f32.mrb[35].mxu1 }
 0x20e   :  { %v3618_v14 = vadd.f32 %v5880_v50, %v3577_v25  ;;  %v5883_v28 = vadd.f32 %v5882_v33, %v5881_v23 }
 0x210   :  { %v3621_v35 = vadd.f32 %v5883_v28, %v3580_v47  ;;  %v3659_v57 = vadd.f32 %v5902_v7, %v3618_v14  ;;  %v3909_v7 = vmul.f32 %v7667_v6, %v7667_v6 }
 0x212   :  { %v3662_v43 = vadd.f32 %v5905_v30, %v3621_v35 }
 0x21f   :  { %v5944_v44 = vpop.f32.mrb[32].mxu0 }
 0x220   :  { %v5945_v24 = vpop.f32.mrb[33].mxu0 }
 0x221   :  { %v5946_v41 = vadd.f32 %v5945_v24, %v5944_v44  ;;  %v5947_v42 = vpop.f32.mrb[34].mxu0 }
 0x222   :  { %v5948_v59 = vpop.f32.mrb[35].mxu0 }
 0x223   :  { %v5949_v60 = vadd.f32 %v5948_v59, %v5947_v42 }
 0x22a   :  { %v5922_v61 = vpop.f32.mrb[36].mxu1 }
 0x22b   :  { %v5923_v63 = vpop.f32.mrb[37].mxu1 }
 0x22c   :  { %v5924_v52 = vadd.f32 %v5923_v63, %v5922_v61  ;;  %v5925_v53 = vpop.f32.mrb[38].mxu1 }
 0x22d   :  { %v5926_v58 = vpop.f32.mrb[39].mxu1 }
 0x22e   :  { %v3700_v51 = vadd.f32 %v5924_v52, %v3659_v57  ;;  %v5927_v34 = vadd.f32 %v5926_v58, %v5925_v53 }
 0x230   :  { %v3703_v17 = vadd.f32 %v5927_v34, %v3662_v43  ;;  %v3741_v31 = vadd.f32 %v5946_v41, %v3700_v51 }
 0x232   :  { %v3744_v20 = vadd.f32 %v5949_v60, %v3703_v17 }
 0x240   :  { %v5988_v32 = vpop.f32.mrb[36].mxu0 }
 0x241   :  { %v5989_v55 = vpop.f32.mrb[37].mxu0 }
 0x242   :  { %v5990_v62 = vadd.f32 %v5989_v55, %v5988_v32  ;;  %v5991_v4 = vpop.f32.mrb[38].mxu0 }
 0x243   :  { %v5992_v37 = vpop.f32.mrb[39].mxu0 }
 0x244   :  { %v5993_v38 = vadd.f32 %v5992_v37, %v5991_v4 }
 0x24a   :  { %v5966_v39 = vpop.f32.mrb[40].mxu1 }
 0x24b   :  { %v5967_v40 = vpop.f32.mrb[41].mxu1 }
 0x24c   :  { %v5968_v48 = vadd.f32 %v5967_v40, %v5966_v39  ;;  %v5969_v54 = vpop.f32.mrb[42].mxu1 }
 0x24d   :  { %v5970_v1 = vpop.f32.mrb[43].mxu1 }
 0x24e   :  { %v3782_v25 = vadd.f32 %v5968_v48, %v3741_v31  ;;  %v5971_v3 = vadd.f32 %v5970_v1, %v5969_v54 }
 0x250   :  { %v3785_v47 = vadd.f32 %v5971_v3, %v3744_v20  ;;  %v3823_v29 = vadd.f32 %v5990_v62, %v3782_v25 }
 0x252   :  { %v3826_v2 = vadd.f32 %v5993_v38, %v3785_v47  ;;  %v6526_v47 = vld [vmem:[%s7949_s5 + $0x100] ss:$8 sps:$4 sm:$0xff]  }
 0x256   :  { %v3863_v56 = vpop.f32.mrb[44].mxu1 }
 0x257   :  { %v3864_v46 = vadd.f32 %v3863_v56, %v3823_v29  ;;  %v6062_v5 = vpop.f32.mrb[45].mxu1  ;;  %v6712_v29 = vmov 0   ;;  %v6532_v56 = vld [vmem:[%s7949_s5 + $0x120] ss:$8 sps:$4 sm:$0xff]  }
 0x258   :  { %v3866_v26 = vpop.f32.mrb[46].mxu1  ;;  %v6535_v5 = vld [vmem:[%s7949_s5 + $0x130] ss:$8 sps:$4 sm:$0xff]  }
 0x259   :  { %v3870_v27 = vmax.f32 %v3864_v46, 1e-12  ;;  %v3867_v16 = vadd.f32 %v3866_v26, %v3826_v2  ;;  %v6063_v18 = vpop.f32.mrb[47].mxu1  ;;  %v6534_v2 = vld [vmem:[%s7949_s5 + $0x124] ss:$8 sps:$4 sm:$0xff]  }
 0x25a   :  { %v6537_v46 = vld [vmem:[%s7949_s5 + $0x134] ss:$8 sps:$4 sm:$0xff]   ;;  %v6540_v26 = vld [vmem:[%s7949_s5 + $0x144] ss:$8 sps:$4 sm:$0xff]  }
 0x25b   :  { %6586 = vrsqrt.f32 %v3870_v27  ;;  %v3910_v21 = vadd.f32 %v3908_v10, %v3870_v27  ;;  %v3871_v0 = vmax.f32 %v3867_v16, 1e-12  ;;  %v6543_v10 = vld [vmem:[%s7949_s5 + $0x154] ss:$8 sps:$4 sm:$0xff]   ;;  %v6541_v16 = vld [vmem:[%s7949_s5 + $0x150] ss:$8 sps:$4 sm:$0xff]  }
 0x25c   :  { %v6546_v18 = vld [vmem:[%s7949_s5 + $0x164] ss:$8 sps:$4 sm:$0xff]  }
 0x25d   :  { %6588 = vrsqrt.f32 %v3871_v0  ;;  %v3911_v8 = vadd.f32 %v3909_v7, %v3871_v0  ;;  %v6547_v7 = vld [vmem:[%s7949_s5 + $0x170] ss:$8 sps:$4 sm:$0xff]  }
 0x265   :  { %v6587_v45 = vpop.eup %6586 }
 0x266   :  { %v3874_v30 = vmul.f32 %v6587_v45, %v3870_v27  ;;  %v3876_v11 = vmul.f32 %v6587_v45, %v7665_v49  ;;  %v6538_v27 = vld [vmem:[%s7949_s5 + $0x140] ss:$8 sps:$4 sm:$0xff]   ;;  %v6550_v45 = vld [vmem:[#allocation6 + $0x40] sm:$0xff]  }
 0x267   :  { %v6589_v36 = vpop.eup %6588  ;;  %5998 = vmatprep.subr.bf16.mxu1 %v6550_v45 }
 0x268   :  { %v5447_v12 = vmul.f32 -1.5957692, %v3876_v11  ;;  %v3892_v15 = vmul.f32 -0.5, %v3876_v11  ;;  %v3914_v13 = vmul.f32 %v3874_v30, %v7665_v49  ;;  %v3875_v22 = vmul.f32 %v6589_v36, %v3871_v0  ;;  %v6549_v0 = vld [vmem:[%s7949_s5 + $0x174] ss:$8 sps:$4 sm:$0xff]  }
 0x269   :  { %v3877_v50 = vmul.f32 %v6589_v36, %v7667_v6  ;;  %v6553_v36 = vld [vmem:[#allocation6 + $0x8] sm:$0xff]  }
 0x26a   :  { %v3882_v23 = vmul.f32 1.442695, %v5447_v12  ;;  %v3894_v33 = vmul.f32 %v3892_v15, %v3876_v11  ;;  %v3915_v14 = vmul.f32 %v3875_v22, %v7667_v6  ;;  %v6552_v11 = vld [vmem:[#allocation6 + $0x48] sm:$0xff]   ;;  %v6554_v12 = vld [vmem:[#allocation6 + $0x50] sm:$0xff]  }
 0x26b   :  { %v5448_v28 = vmul.f32 -1.5957692, %v3877_v50  ;;  %v3893_v19 = vmul.f32 -0.5, %v3877_v50  ;;  %v6555_v15 = vld [vmem:[#allocation6 + $0x10] sm:$0xff]  }
 0x26c   :  { %6590 = vpow2.f32 %v3882_v23  ;;  %v3896_v35 = vmul.f32 1.442695, %v3894_v33  ;;  %v6559_v23 = vld [vmem:[#allocation6 + $0x20] sm:$0xff]   ;;  %v6560_v33 = vld [vmem:[#allocation6 + $0x68] sm:$0xff]  }
 0x26d   :  { %v3884_v57 = vmul.f32 1.442695, %v5448_v28  ;;  %v3895_v43 = vmul.f32 %v3893_v19, %v3877_v50  ;;  %v6558_v50 = vld [vmem:[#allocation6 + $0x60] sm:$0xff]   ;;  %v6562_v28 = vld [vmem:[#allocation6 + $0x70] sm:$0xff]  }
 0x26e   :  { %6592 = vpow2.f32 %v3896_v35  ;;  %v6563_v19 = vld [vmem:[#allocation6 + $0x30] sm:$0xff]   ;;  %v6564_v35 = vld [vmem:[#allocation6 + $0x78] sm:$0xff]  }
 0x26f   :  { %6594 = vpow2.f32 %v3884_v57  ;;  %v3898_v44 = vmul.f32 1.442695, %v3895_v43  ;;  %v6565_v57 = vld [vmem:[#allocation6 + $0x38] sm:$0xff]   ;;  %v5526_v43 = vld [vmem:[%s7954_s10] ss:$0 sm:$0xff] }
 0x270   :  { %4665 = vrot.lane.b32.xlu0 %v5526_v43, %s6707_s18  ;;  %v6566_v43 = vld [vmem:[#allocation6 + $0x80] sm:$0xff]  }
 0x271   :  { %6596 = vpow2.f32 %v3898_v44  ;;  %v5497_v44 = vld [vmem:[%s7950_s6] ss:$0 sm:$0xff] }
 0x276   :  { %v6591_v24 = vpop.eup %6590 }
 0x277   :  { %v3886_v41 = vadd.f32 1.0, %v6591_v24  ;;  %v5498_v24 = vld [vmem:[%s7951_s7] ss:$0 sm:$0xff] }
 0x278   :  { %v6593_v42 = vpop.eup %6592 }
 0x279   :  { %v6595_v59 = vpop.eup %6594  ;;  %6598 = vrcp.f32 %v3886_v41  ;;  %v3900_v60 = vmul.f32 0.3989423, %v6593_v42 }
 0x27a   :  { %v3887_v61 = vadd.f32 1.0, %v6595_v59 }
 0x27b   :  { %v6597_v63 = vpop.eup %6596  ;;  %v3904_v52 = vmul.f32 %v3900_v60, %v3874_v30  ;;  %v3916_v53 = vmul.f32 %v3914_v13, %v3900_v60  ;;  %v6551_v30 = vld [vmem:[#allocation6] sm:$0xff]   ;;  %v6556_v13 = vld [vmem:[#allocation6 + $0x58] sm:$0xff]  }
 0x27c   :  { %6600 = vrcp.f32 %v3887_v61  ;;  %v3901_v58 = vmul.f32 0.3989423, %v6597_v63  ;;  %5999 = vmatpush3.bf16.msra.mxu1 %v6551_v30 }
 0x27d   :  { %6000 = vmatprep.subr.bf16.mxu1 %v6552_v11 }
 0x27e   :  { %v3905_v51 = vmul.f32 %v3901_v58, %v3875_v22  ;;  %v3917_v34 = vmul.f32 %v3915_v14, %v3901_v58  ;;  %v6557_v22 = vld [vmem:[#allocation6 + $0x18] sm:$0xff]   ;;  %v6561_v14 = vld [vmem:[#allocation6 + $0x28] sm:$0xff]  }
 0x280   :  { %6001 = vmatpush3.bf16.msra.mxu1 %v6553_v36 }
 0x281   :  { %6002 = vmatprep.subr.bf16.mxu1 %v6554_v12 }
 0x283   :  { %v6599_v17 = vpop.eup %6598 }
 0x284   :  { %v3902_v31 = vmul.f32 %v6599_v17, %v7665_v49  ;;  %v3912_v20 = vmul.f32 %v6599_v17, %v3910_v21  ;;  %v6531_v49 = vld [vmem:[%s7949_s5 + $0x114] ss:$8 sps:$4 sm:$0xff]   ;;  %v6544_v21 = vld [vmem:[%s7949_s5 + $0x160] ss:$8 sps:$4 sm:$0xff]   ;;  %6003 = vmatpush3.bf16.msra.mxu1 %v6555_v15 }
 0x285   :  { %6004 = vmatprep.subr.bf16.mxu1 %v6556_v13 }
 0x286   :  { %v6601_v32 = vpop.eup %6600  ;;  %v3906_v55 = vadd.f32 %v3904_v52, %v3902_v31  ;;  %v3918_v62 = vadd.f32 %v3916_v53, %v3912_v20 }
 0x287   :  { %v3903_v4 = vmul.f32 %v6601_v32, %v7667_v6  ;;  %v3913_v37 = vmul.f32 %v6601_v32, %v3911_v8  ;;  %v6529_v6 = vld [vmem:[%s7949_s5 + $0x110] ss:$8 sps:$4 sm:$0xff]  }
 0x288   :  { %v3920_v38 = vmul.f32 %v3906_v55, %v3906_v55  ;;  %6005 = vmatpush3.bf16.msra.mxu1 %v6557_v22 }
 0x289   :  { %v3907_v39 = vadd.f32 %v3905_v51, %v3903_v4  ;;  %v3919_v40 = vadd.f32 %v3917_v34, %v3913_v37  ;;  %6006 = vmatprep.subr.bf16.mxu1 %v6558_v50 }
 0x28a   :  { %v3922_v48 = vsub.f32 %v3918_v62, %v3920_v38 }
 0x28b   :  { %v3921_v54 = vmul.f32 %v3907_v39, %v3907_v39  ;;  %v3974_v1 = vpack.c.bf16 %v3907_v39, %v3906_v55 }
 0x28c   :  { %6007 = vmatpush3.bf16.msra.mxu1 %v6559_v23 }
 0x28d   :  { %v3923_v25 = vsub.f32 %v3919_v40, %v3921_v54  ;;  %v3976_v8 = vmul.bf16 %v3974_v1, %v3974_v1  ;;  %6008 = vmatprep.subr.bf16.mxu1 %v6560_v33 }
 0x28f   :  { %v3975_v3 = vpack.c.bf16 %v3923_v25, %v3922_v48 }
 0x290   :  { %6009 = vmatpush3.bf16.msra.mxu1 %v6561_v14 }
 0x291   :  { %4249 = vmatprep.mubr.bf16.mxu0 %v3975_v3  ;;  %6010 = vmatprep.subr.bf16.mxu1 %v6562_v28 }
 0x292   :  { %4250 = vmatmul.mubr.bf16.vlgmr.msra.gmra.mrb[40].mxu0 %v3974_v1 }
 0x293   :  { %4261 = vmatpush1.bf16.msra.mxu0 %v6526_v47  ;;  %4292 = vmatprep.mubr.bf16.mxu0 %v6712_v29 }
 0x294   :  { %4262 = vmatprep.subr.bf16.mxu0 %v6531_v49  ;;  %6011 = vmatpush3.bf16.msra.mxu1 %v6563_v19 }
 0x295   :  { %6012 = vmatprep.subr.bf16.mxu1 %v6564_v35 }
 0x297   :  { %4263 = vmatpush1.bf16.msra.mxu0 %v6529_v6 }
 0x298   :  { %4264 = vmatprep.subr.bf16.mxu0 %v6534_v2  ;;  %6013 = vmatpush3.bf16.msra.mxu1 %v6565_v57 }
 0x299   :  { %6064 = vmatprep.subr.bf16.mxu1 %v6710_v9 }
 0x29b   :  { %4265 = vmatpush1.bf16.msra.mxu0 %v6532_v56 }
 0x29c   :  { %4266 = vmatprep.subr.bf16.mxu0 %v6537_v46 }
 0x29f   :  { %4267 = vmatpush1.bf16.msra.mxu0 %v6535_v5 }
 0x2a0   :  { %4268 = vmatprep.subr.bf16.mxu0 %v6540_v26 }
 0x2a3   :  { %4269 = vmatpush1.bf16.msra.mxu0 %v6538_v27 }
 0x2a4   :  { %4270 = vmatprep.subr.bf16.mxu0 %v6543_v10 }
 0x2a7   :  { %4271 = vmatpush1.bf16.msra.mxu0 %v6541_v16 }
 0x2a8   :  { %4272 = vmatprep.subr.bf16.mxu0 %v6546_v18 }
 0x2ab   :  { %4273 = vmatpush1.bf16.msra.mxu0 %v6544_v21 }
 0x2ac   :  { %4274 = vmatprep.subr.bf16.mxu0 %v6549_v0 }
 0x2af   :  { %4275 = vmatpush1.bf16.msra.mxu0 %v6547_v7 }
 0x2b0   :  { %6108 = vmatprep.subr.bf16.mxu0 %v6710_v9 }
 0x2b2   :  { %4293 = vmatmul.mubr.bf16.vlgmr.msra.gmra.mrb[40].mxu0 %v3976_v8 }
 0x2b3   :  { %6116 = vmatprep.mubr.msk.bf16.mxu0 %vm6711_vm0, %v6710_v9 }
 0x385   :  { %v4294_v41 = vpop.f32.mrb[40].mxu0 }
 0x386   :  { %v4309_v42 = vadd.f32 %v5497_v44, %v4294_v41  ;;  %v4296_v59 = vpop.f32.mrb[41].mxu0  ;;  %v6569_v41 = vld [vmem:[#allocation6 + $0x98] sm:$0xff]  }
 0x387   :  { %v4317_v60 = vadd.f32 %v5498_v24, %v4296_v59  ;;  %v4298_v61 = vpop.f32.mrb[42].mxu0  ;;  %v6571_v59 = vld [vmem:[#allocation6 + $0xa8] sm:$0xff]  }
 0x388   :  { %v4357_v63 = vmul.f32 %v4309_v42, %v4309_v42  ;;  %v4310_v52 = vadd.f32 %v5497_v44, %v4298_v61  ;;  %v4300_v53 = vpop.f32.mrb[43].mxu0  ;;  %v6567_v44 = vld [vmem:[#allocation6 + $0x88] sm:$0xff]   ;;  %v6573_v61 = vld [vmem:[#allocation6 + $0xb8] sm:$0xff]  }
 0x389   :  { %v4319_v58 = vmax.f32 %v4317_v60, 1e-12  ;;  %v4318_v51 = vadd.f32 %v5498_v24, %v4300_v53  ;;  %v6568_v24 = vld [vmem:[#allocation6 + $0x90] sm:$0xff]  }
 0x38a   :  { %v4358_v34 = vmul.f32 %v4310_v52, %v4310_v52  ;;  %v6572_v60 = vld [vmem:[#allocation6 + $0xb0] sm:$0xff]  }
 0x38b   :  { %6602 = vrsqrt.f32 %v4319_v58  ;;  %v4359_v17 = vadd.f32 %v4357_v63, %v4319_v58  ;;  %v4320_v31 = vmax.f32 %v4318_v51, 1e-12 }
 0x38d   :  { %6604 = vrsqrt.f32 %v4320_v31  ;;  %v4360_v20 = vadd.f32 %v4358_v34, %v4320_v31 }
 0x395   :  { %v6603_v32 = vpop.eup %6602 }
 0x396   :  { %v4323_v55 = vmul.f32 %v6603_v32, %v4319_v58  ;;  %v4325_v62 = vmul.f32 %v6603_v32, %v4309_v42 }
 0x397   :  { %v6605_v4 = vpop.eup %6604 }
 0x398   :  { %v5499_v37 = vmul.f32 -1.5957692, %v4325_v62  ;;  %v4341_v38 = vmul.f32 -0.5, %v4325_v62  ;;  %v4363_v39 = vmul.f32 %v4323_v55, %v4309_v42  ;;  %v4324_v40 = vmul.f32 %v6605_v4, %v4320_v31 }
 0x399   :  { %v4326_v48 = vmul.f32 %v6605_v4, %v4310_v52 }
 0x39a   :  { %v4331_v54 = vmul.f32 1.442695, %v5499_v37  ;;  %v4343_v1 = vmul.f32 %v4341_v38, %v4325_v62  ;;  %v4364_v25 = vmul.f32 %v4324_v40, %v4310_v52 }
 0x39b   :  { %v5500_v3 = vmul.f32 -1.5957692, %v4326_v48  ;;  %v4342_v47 = vmul.f32 -0.5, %v4326_v48 }
 0x39c   :  { %6606 = vpow2.f32 %v4331_v54  ;;  %v4345_v49 = vmul.f32 1.442695, %v4343_v1 }
 0x39d   :  { %v4333_v6 = vmul.f32 1.442695, %v5500_v3  ;;  %v4344_v29 = vmul.f32 %v4342_v47, %v4326_v48 }
 0x39e   :  { %6608 = vpow2.f32 %v4345_v49 }
 0x39f   :  { %6610 = vpow2.f32 %v4333_v6  ;;  %v4347_v2 = vmul.f32 1.442695, %v4344_v29 }
 0x3a1   :  { %6612 = vpow2.f32 %v4347_v2 }
 0x3a6   :  { %v6607_v56 = vpop.eup %6606 }
 0x3a7   :  { %v4335_v46 = vadd.f32 1.0, %v6607_v56 }
 0x3a8   :  { %v6609_v5 = vpop.eup %6608 }
 0x3a9   :  { %v6611_v26 = vpop.eup %6610  ;;  %6614 = vrcp.f32 %v4335_v46  ;;  %v4349_v27 = vmul.f32 0.3989423, %v6609_v5 }
 0x3aa   :  { %v4336_v10 = vadd.f32 1.0, %v6611_v26 }
 0x3ab   :  { %v6613_v16 = vpop.eup %6612  ;;  %v4353_v18 = vmul.f32 %v4349_v27, %v4323_v55  ;;  %v4365_v21 = vmul.f32 %v4363_v39, %v4349_v27 }
 0x3ac   :  { %6616 = vrcp.f32 %v4336_v10  ;;  %v4350_v0 = vmul.f32 0.3989423, %v6613_v16 }
 0x3ae   :  { %v4354_v7 = vmul.f32 %v4350_v0, %v4324_v40  ;;  %v4366_v8 = vmul.f32 %v4364_v25, %v4350_v0  ;;  %v5525_v25 = vld [vmem:[%s7953_s9] ss:$0 sm:$0xff] }
 0x3af   :  { %v6574_v0 = vld [vmem:[%s7955_s11] sm:$0xff]  }
 0x3b3   :  { %v6615_v45 = vpop.eup %6614 }
 0x3b4   :  { %v4351_v30 = vmul.f32 %v6615_v45, %v4309_v42  ;;  %v4361_v11 = vmul.f32 %v6615_v45, %v4359_v17  ;;  %v6570_v42 = vld [vmem:[#allocation6 + $0xa0] sm:$0xff]  }
 0x3b5   :  { %v6576_v45 = vld [vmem:[%s7955_s11 + $0x10] sm:$0xff]  }
 0x3b6   :  { %v6617_v36 = vpop.eup %6616  ;;  %v4355_v12 = vadd.f32 %v4353_v18, %v4351_v30  ;;  %v4367_v15 = vadd.f32 %v4365_v21, %v4361_v11  ;;  %v6577_v30 = vld [vmem:[%s7955_s11 + $0x18] sm:$0xff]   ;;  %v6578_v11 = vld [vmem:[%s7956_s12] sm:$0xff]  }
 0x3b7   :  { %v4352_v13 = vmul.f32 %v6617_v36, %v4310_v52  ;;  %v4362_v22 = vmul.f32 %v6617_v36, %v4360_v20  ;;  %v4666_v20 = vpop.permute.xlu0 %4665  ;;  %6109 = vmatpush3.bf16.msra.mxu0 %v6578_v11  ;;  %v6580_v36 = vld [vmem:[%s7956_s12 + $0x8] sm:$0xff]  }
 0x3b8   :  { %v4369_v50 = vmul.f32 %v4355_v12, %v4355_v12  ;;  %6110 = vmatprep.subr.bf16.mxu0 %v6710_v9 }
 0x3b9   :  { %v4356_v23 = vadd.f32 %v4354_v7, %v4352_v13  ;;  %v4368_v33 = vadd.f32 %v4366_v8, %v4362_v22  ;;  %v6575_v8 = vld [vmem:[%s7955_s11 + $0x8] sm:$0xff]  }
 0x3ba   :  { %v4371_v14 = vsub.f32 %v4367_v15, %v4369_v50 }
 0x3bb   :  { %v4370_v28 = vmul.f32 %v4356_v23, %v4356_v23  ;;  %v4423_v19 = vpack.c.bf16 %v4356_v23, %v4355_v12  ;;  %6111 = vmatpush3.bf16.msra.mxu0 %v6580_v36  ;;  %v6582_v23 = vld [vmem:[%s7956_s12 + $0x10] sm:$0xff]  }
 0x3bc   :  { %6112 = vmatprep.subr.bf16.mxu0 %v6710_v9 }
 0x3bd   :  { %v4372_v35 = vsub.f32 %v4368_v33, %v4370_v28  ;;  %v4425_v63 = vmul.bf16 %v4423_v19, %v4423_v19 }
 0x3bf   :  { %v4424_v57 = vpack.c.bf16 %v4372_v35, %v4371_v14  ;;  %6113 = vmatpush3.bf16.msra.mxu0 %v6582_v23  ;;  %v6584_v14 = vld [vmem:[%s7956_s12 + $0x18] sm:$0xff]  }
 0x3c0   :  { %6114 = vmatprep.subr.bf16.mxu0 %v6710_v9 }
 0x3c1   :  { %4602 = vmatprep.mubr.bf16.mxu1 %v4424_v57 }
 0x3c2   :  { %4603 = vmatmul.mubr.bf16.vlgmr.msra.gmra.mrb[48].mxu1 %v4423_v19 }
 0x3c3   :  { %6065 = vmatpush3.bf16.msra.mxu1 %v6566_v43  ;;  %6080 = vmatprep.mubr.msk.bf16.mxu1 %vm6711_vm0, %v6710_v9 }
 0x3c4   :  { %6066 = vmatprep.subr.bf16.mxu1 %v6710_v9  ;;  %6115 = vmatpush3.bf16.msra.mxu0 %v6584_v14 }
 0x3c7   :  { %6067 = vmatpush3.bf16.msra.mxu1 %v6567_v44 }
 0x3c8   :  { %6068 = vmatprep.subr.bf16.mxu1 %v6710_v9 }
 0x3cb   :  { %6069 = vmatpush3.bf16.msra.mxu1 %v6568_v24 }
 0x3cc   :  { %6070 = vmatprep.subr.bf16.mxu1 %v6710_v9 }
 0x3cf   :  { %6071 = vmatpush3.bf16.msra.mxu1 %v6569_v41 }
 0x3d0   :  { %6072 = vmatprep.subr.bf16.mxu1 %v6710_v9 }
 0x3d3   :  { %6073 = vmatpush3.bf16.msra.mxu1 %v6570_v42 }
 0x3d4   :  { %6074 = vmatprep.subr.bf16.mxu1 %v6710_v9 }
 0x3d7   :  { %6075 = vmatpush3.bf16.msra.mxu1 %v6571_v59 }
 0x3d8   :  { %6076 = vmatprep.subr.bf16.mxu1 %v6710_v9 }
 0x3db   :  { %6077 = vmatpush3.bf16.msra.mxu1 %v6572_v60 }
 0x3dc   :  { %6078 = vmatprep.subr.bf16.mxu1 %v6710_v9 }
 0x3df   :  { %6079 = vmatpush3.bf16.msra.mxu1 %v6573_v61 }
 0x3e0   :  { %6084 = vmatprep.subr.bf16.mxu1 %v6710_v9 }
 0x3e2   :  { %6081 = vmatmul.mubr.bf16.vlgmr.msra.gmra.mrb[52].mxu1 %v4425_v63 }
 0x3e3   :  { %6092 = vmatprep.mubr.msk.bf16.mxu1 %vm6711_vm0, %v6710_v9  ;;  %6085 = vmatpush3.bf16.msra.mxu1 %v6574_v0 }
 0x3e4   :  { %6086 = vmatprep.subr.bf16.mxu1 %v6710_v9 }
 0x3e7   :  { %6087 = vmatpush3.bf16.msra.mxu1 %v6575_v8  ;;  %v5545_v8 = vld [vmem:[#allocation3] ss:$0 sm:$0xff] }
 0x3e8   :  { %6088 = vmatprep.subr.bf16.mxu1 %v6710_v9 }
 0x3eb   :  { %6089 = vmatpush3.bf16.msra.mxu1 %v6576_v45 }
 0x3ec   :  { %6090 = vmatprep.subr.bf16.mxu1 %v6710_v9 }
 0x3ef   :  { %6091 = vmatpush3.bf16.msra.mxu1 %v6577_v30 }
 0x3f0   :  { %6096 = vmatprep.subr.bf16.mxu1 %v6710_v9 }
 0x495   :  { %v6014_v52 = vpop.f32.mrb[48].mxu1 }
 0x496   :  { %v6015_v53 = vpop.f32.mrb[49].mxu1 }
 0x497   :  { %v6016_v58 = vadd.f32 %v6015_v53, %v6014_v52  ;;  %v6017_v51 = vpop.f32.mrb[50].mxu1 }
 0x498   :  { %v6018_v34 = vpop.f32.mrb[51].mxu1 }
 0x499   :  { %v6019_v17 = vadd.f32 %v6018_v34, %v6017_v51  ;;  %v6579_v51 = vld [vmem:[%s7957_s13] sm:$0xff]  }
 0x4b5   :  { %v4645_v31 = vpop.f32.mrb[52].mxu1 }
 0x4b6   :  { %v4646_v32 = vadd.f32 %v6016_v58, %v4645_v31  ;;  %v6082_v55 = vpop.f32.mrb[53].mxu1 }
 0x4b7   :  { %v4648_v62 = vpop.f32.mrb[54].mxu1 }
 0x4b8   :  { %v4668_v4 = vadd.f32 %v4666_v20, %v4646_v32  ;;  %v4649_v37 = vadd.f32 %v6019_v17, %v4648_v62  ;;  %v6083_v38 = vpop.f32.mrb[55].mxu1  ;;  %v7857_v3 = vadd.f32 %v5525_v25, %v4646_v32  ;;  %v6581_v62 = vld [vmem:[%s7957_s13 + $0x8] sm:$0xff]  }
 0x4ba   :  { %v4670_v39 = vmax.f32 %v4668_v4, 1e-12  ;;  %v4669_v40 = vadd.f32 %v4666_v20, %v4649_v37  ;;  %v7859_v49 = vadd.f32 %v5525_v25, %v4649_v37  ;;  %v4732_v31 = vmul.f32 %v7857_v3, %v7857_v3 }
 0x4bc   :  { %6618 = vrsqrt.f32 %v4670_v39  ;;  %v4671_v48 = vmax.f32 %v4669_v40, 1e-12  ;;  %v4733_v32 = vmul.f32 %v7859_v49, %v7859_v49 }
 0x4be   :  { %6620 = vrsqrt.f32 %v4671_v48 }
 0x4c6   :  { %v6619_v54 = vpop.eup %6618 }
 0x4c7   :  { %4678 = vrot.lane.b32.xlu0 %v6619_v54, %s6707_s18  ;;  %v4674_v12 = vmul.f32 %v6619_v54, %v4670_v39 }
 0x4c8   :  { %v6621_v1 = vpop.eup %6620 }
 0x4c9   :  { %4680 = vrot.lane.b32.xlu1 %v6621_v1, %s6707_s18  ;;  %v4675_v13 = vmul.f32 %v6621_v1, %v4671_v48  ;;  %v6583_v1 = vld [vmem:[%s7957_s13 + $0x10] sm:$0xff]  }
 0x539   :  { %v4679_v47 = vpop.permute.xlu0 %4678 }
 0x53a   :  { %v4684_v6 = vmul.f32 %v4679_v47, %v7857_v3 }
 0x53b   :  { %v4681_v29 = vpop.permute.xlu1 %4680 }
 0x53c   :  { %v4700_v2 = vmul.f32 -0.5, %v4684_v6  ;;  %v4685_v56 = vmul.f32 %v4681_v29, %v7859_v49  ;;  %v5527_v28 = vmul.f32 -1.5957692, %v4684_v6 }
 0x53e   :  { %v4702_v46 = vmul.f32 %v4700_v2, %v4684_v6  ;;  %v4701_v5 = vmul.f32 -0.5, %v4685_v56  ;;  %v5528_v19 = vmul.f32 -1.5957692, %v4685_v56  ;;  %v4690_v35 = vmul.f32 1.442695, %v5527_v28 }
 0x540   :  { %v4703_v26 = vmul.f32 %v4701_v5, %v4685_v56  ;;  %v4704_v27 = vmul.f32 1.442695, %v4702_v46  ;;  %v4692_v57 = vmul.f32 1.442695, %v5528_v19 }
 0x542   :  { %v4706_v10 = vmul.f32 1.442695, %v4703_v26  ;;  %6622 = vpow2.f32 %v4704_v27 }
 0x544   :  { %6624 = vpow2.f32 %v4706_v10 }
 0x545   :  { %6626 = vpow2.f32 %v4690_v35 }
 0x546   :  { %6628 = vpow2.f32 %v4692_v57 }
 0x54c   :  { %v6623_v16 = vpop.eup %6622 }
 0x54d   :  { %v7863_v21 = vmul.f32 0.3989423, %v6623_v16 }
 0x54e   :  { %v6625_v18 = vpop.eup %6624 }
 0x54f   :  { %v7868_v7 = vmul.f32 0.3989423, %v6625_v18  ;;  %4714 = vrot.lane.b32.xlu1 %v7863_v21, %s6707_s18  ;;  %v6627_v43 = vpop.eup %6626 }
 0x550   :  { %v6629_v44 = vpop.eup %6628  ;;  %v4694_v24 = vadd.f32 1.0, %v6627_v43  ;;  %v5529_v43 = vld [vmem:[#allocation2] ss:$0 sm:$0xff] }
 0x551   :  { %4716 = vrot.lane.b32.xlu0 %v7868_v7, %s6707_s18  ;;  %v4695_v41 = vadd.f32 1.0, %v6629_v44 }
 0x552   :  { %6630 = vrcp.f32 %v4694_v24 }
 0x553   :  { %6632 = vrcp.f32 %v4695_v41 }
 0x55c   :  { %v6631_v42 = vpop.eup %6630 }
 0x55d   :  { %v6633_v59 = vpop.eup %6632  ;;  %v4710_v61 = vmul.f32 %v6631_v42, %v7857_v3 }
 0x55e   :  { %v4711_v63 = vmul.f32 %v6633_v59, %v7859_v49 }
 0x5c1   :  { %v4715_v15 = vpop.permute.xlu1 %4714 }
 0x5c2   :  { %v4720_v22 = vmul.f32 %v4715_v15, %v4674_v12 }
 0x5c3   :  { %v4717_v50 = vpop.permute.xlu0 %4716 }
 0x5c4   :  { %v4721_v33 = vmul.f32 %v4717_v50, %v4675_v13  ;;  %4724 = vrot.lane.b32.xlu1 %v4720_v22, %s6707_s18 }
 0x5c6   :  { %4726 = vrot.lane.b32.xlu0 %v4721_v33, %s6707_s18 }
 0x5c8   :  { %4736 = vrot.lane.b32.xlu1 %v4670_v39, %s6707_s18 }
 0x5ca   :  { %4738 = vrot.lane.b32.xlu0 %v4671_v48, %s6707_s18 }
 0x5cc   :  { %4748 = vrot.lane.b32.xlu1 %v4674_v12, %s6707_s18 }
 0x5ce   :  { %4750 = vrot.lane.b32.xlu0 %v4675_v13, %s6707_s18 }
 0x636   :  { %v4725_v60 = vpop.permute.xlu1 %4724 }
 0x637   :  { %v4730_v53 = vadd.f32 %v4725_v60, %v4710_v61 }
 0x638   :  { %v4727_v52 = vpop.permute.xlu0 %4726 }
 0x639   :  { %v4731_v58 = vadd.f32 %v4727_v52, %v4711_v63  ;;  %v4760_v29 = vmul.f32 %v4730_v53, %v4730_v53 }
 0x63a   :  { %v4737_v17 = vpop.permute.xlu1 %4736 }
 0x63b   :  { %v4764_v34 = vpack.c.bf16 %v4731_v58, %v4730_v53  ;;  %v4742_v55 = vadd.f32 %v4737_v17, %v4732_v31  ;;  %v4761_v2 = vmul.f32 %v4731_v58, %v4731_v58 }
 0x63c   :  { %v4739_v20 = vpop.permute.xlu0 %4738 }
 0x63d   :  { %6093 = vmatmul.mubr.msk.bf16.vlgmr.msra.gmra.mrb[56].mxu1 %vm4805_vm3, %v4764_v34  ;;  %v4743_v4 = vadd.f32 %v4739_v20, %v4733_v32  ;;  %v4744_v48 = vmul.f32 %v6631_v42, %v4742_v55  ;;  %v4858_v26 = vmul.bf16 %v4764_v34, %v4764_v34 }
 0x63e   :  { %6097 = vmatpush3.bf16.msra.mxu1 %v6579_v51  ;;  %6104 = vmatprep.mubr.msk.bf16.mxu1 %vm6711_vm0, %v6710_v9  ;;  %v4749_v37 = vpop.permute.xlu1 %4748 }
 0x63f   :  { %6098 = vmatprep.subr.bf16.mxu1 %v6710_v9  ;;  %v4754_v38 = vmul.f32 %v4749_v37, %v7857_v3  ;;  %v4745_v25 = vmul.f32 %v6633_v59, %v4743_v4 }
 0x640   :  { %v4751_v39 = vpop.permute.xlu0 %4750 }
 0x641   :  { %v4755_v40 = vmul.f32 %v4751_v39, %v7859_v49  ;;  %v4756_v54 = vmul.f32 %v4754_v38, %v7863_v21  ;;  %v6585_v49 = vld [vmem:[%s7957_s13 + $0x18] sm:$0xff]  }
 0x642   :  { %6099 = vmatpush3.bf16.msra.mxu1 %v6581_v62 }
 0x643   :  { %v4757_v47 = vmul.f32 %v4755_v40, %v7868_v7  ;;  %6100 = vmatprep.subr.bf16.mxu1 %v6710_v9  ;;  %v4758_v6 = vadd.f32 %v4756_v54, %v4744_v48 }
 0x645   :  { %v4759_v3 = vadd.f32 %v4757_v47, %v4745_v25  ;;  %v4762_v56 = vsub.f32 %v4758_v6, %v4760_v29 }
 0x646   :  { %6101 = vmatpush3.bf16.msra.mxu1 %v6583_v1 }
 0x647   :  { %v4763_v46 = vsub.f32 %v4759_v3, %v4761_v2  ;;  %6102 = vmatprep.subr.bf16.mxu1 %v6710_v9 }
 0x649   :  { %v4765_v5 = vpack.c.bf16 %v4763_v46, %v4762_v56 }
 0x64a   :  { %6103 = vmatpush3.bf16.msra.mxu1 %v6585_v49 }
 0x64b   :  { %6117 = vmatmul.mubr.msk.bf16.vlgmr.msra.gmra.mrb[44].mxu0 %vm4805_vm3, %v4765_v5 }
 0x64d   :  { %6105 = vmatmul.mubr.msk.bf16.vlgmr.msra.gmra.mrb[60].mxu1 %vm4805_vm3, %v4858_v26 }
 0x710   :  { %v4843_v27 = vpop.f32.mrb[56].mxu1 }
 0x711   :  { %v6094_v10 = vpop.f32.mrb[57].mxu1  ;;  %v4844_v41 = vadd.f32 %v5529_v43, %v4843_v27 }
 0x712   :  { %v4846_v16 = vpop.f32.mrb[58].mxu1 }
 0x713   :  { %v6095_v18 = vpop.f32.mrb[59].mxu1  ;;  %v4847_v42 = vadd.f32 %v5529_v43, %v4846_v16  ;;  %v5034_v59 = vadd.f32 -0.8813736, %v4844_v41 }
 0x715   :  { %v5035_v60 = vadd.f32 -0.8813736, %v4847_v42  ;;  %v5036_v63 = vmul.f32 1.1715729, %v5034_v59 }
 0x717   :  { %v5037_v51 = vmul.f32 1.1715729, %v5035_v60 }
 0x71e   :  { %v4996_v21 = vpop.f32.mrb[44].mxu0 }
 0x71f   :  { %v6118_v0 = vpop.f32.mrb[45].mxu0 }
 0x720   :  { %v4928_v7 = vpop.f32.mrb[60].mxu1  ;;  %v4999_v45 = vpop.f32.mrb[46].mxu0 }
 0x721   :  { %v4997_v30 = vadd.f32 %v4996_v21, %v4928_v7  ;;  %v6106_v11 = vpop.f32.mrb[61].mxu1  ;;  %v6119_v36 = vpop.f32.mrb[47].mxu0 }
 0x722   :  { %v4931_v9 = vpop.f32.mrb[62].mxu1 }
 0x723   :  { %v5010_v12 = vadd.f32 %v5545_v8, %v4997_v30  ;;  %v5000_v15 = vadd.f32 %v4999_v45, %v4931_v9  ;;  %v6107_v13 = vpop.f32.mrb[63].mxu1 }
 0x725   :  { %v5012_v22 = vmax.f32 %v5010_v12, 0.0  ;;  %v5011_v50 = vadd.f32 %v5545_v8, %v5000_v15 }
 0x727   :  { %v5014_v23 = vmul.f32 0.3926991, %v5012_v22  ;;  %v5038_v33 = vmul.f32 0.5390121, %v5012_v22  ;;  %v5013_v14 = vmax.f32 %v5011_v50, 0.0 }
 0x729   :  { %v5016_v28 = vadd.f32 1.0, %v5014_v23  ;;  %v5040_v19 = vadd.f32 1.0, %v5038_v33  ;;  %v5015_v35 = vmul.f32 0.3926991, %v5013_v14  ;;  %v5039_v57 = vmul.f32 0.5390121, %v5013_v14 }
 0x72b   :  { %6634 = vrsqrt.f32 %v5016_v28  ;;  %v5017_v44 = vadd.f32 1.0, %v5015_v35  ;;  %v5041_v24 = vadd.f32 1.0, %v5039_v57 }
 0x72c   :  { %6636 = vrsqrt.f32 %v5040_v19 }
 0x72d   :  { %6638 = vrsqrt.f32 %v5017_v44 }
 0x72e   :  { %6640 = vrsqrt.f32 %v5041_v24 }
 0x735   :  { %v6635_v61 = vpop.eup %6634 }
 0x736   :  { %v6637_v52 = vpop.eup %6636  ;;  %v5020_v53 = vmul.f32 %v6635_v61, %v4844_v41 }
 0x737   :  { %v6639_v58 = vpop.eup %6638  ;;  %v5044_v34 = vmul.f32 %v6637_v52, %v5036_v63 }
 0x738   :  { %v6641_v17 = vpop.eup %6640  ;;  %v5546_v31 = vmul.f32 -1.442695, %v5020_v53  ;;  %v5021_v20 = vmul.f32 %v6639_v58, %v4847_v42 }
 0x739   :  { %v5548_v32 = vmul.f32 -1.442695, %v5044_v34  ;;  %v5045_v55 = vmul.f32 %v6641_v17, %v5037_v51 }
 0x73a   :  { %6642 = vpow2.f32 %v5546_v31  ;;  %v5547_v62 = vmul.f32 -1.442695, %v5021_v20 }
 0x73b   :  { %6644 = vpow2.f32 %v5548_v32  ;;  %v5549_v4 = vmul.f32 -1.442695, %v5045_v55 }
 0x73c   :  { %6646 = vpow2.f32 %v5547_v62 }
 0x73d   :  { %6648 = vpow2.f32 %v5549_v4 }
 0x744   :  { %v6643_v37 = vpop.eup %6642 }
 0x745   :  { %v6645_v38 = vpop.eup %6644  ;;  %v5028_v39 = vadd.f32 1.0, %v6643_v37 }
 0x746   :  { %v6647_v40 = vpop.eup %6646  ;;  %v5052_v48 = vadd.f32 1.0, %v6645_v38 }
 0x747   :  { %v6649_v54 = vpop.eup %6648  ;;  %6650 = vrcp.f32 %v5028_v39  ;;  %v5029_v1 = vadd.f32 1.0, %v6647_v40 }
 0x748   :  { %6652 = vrcp.f32 %v5052_v48  ;;  %v5053_v25 = vadd.f32 1.0, %v6649_v54 }
 0x749   :  { %6654 = vrcp.f32 %v5029_v1 }
 0x74a   :  { %6656 = vrcp.f32 %v5053_v25 }
 0x751   :  { %v6651_v47 = vpop.eup %6650 }
 0x752   :  { %v6653_v6 = vpop.eup %6652  ;;  %v5058_v29 = vmul.f32 %v6651_v47, %v6651_v47 }
 0x753   :  { %v6655_v2 = vpop.eup %6654 }
 0x754   :  { %v5060_v3 = vsub.f32 %v6653_v6, %v5058_v29  ;;  %v5059_v49 = vmul.f32 %v6655_v2, %v6655_v2  ;;  %v6657_v56 = vpop.eup %6656 }
 0x756   :  { %v5062_v46 = vmul.f32 0.5, %v5060_v3  ;;  %v5061_v5 = vsub.f32 %v6657_v56, %v5059_v49 }
 0x758   :  { %v5064_v26 = vadd.f32 %v6651_v47, %v5062_v46  ;;  %v5063_v27 = vmul.f32 0.5, %v5061_v5 }
 0x75a   :  { %5067 = vst.msk [vmem:[%s7959_s16] sm:$0xff] %vm5066_vm4, %v5064_v26  ;;  %v5065_v10 = vadd.f32 %v6655_v2, %v5063_v27 }
 0x75c   :  { %5068 = vst.msk [vmem:[%s7959_s16 + $0x8] sm:$0xff] %vm5066_vm4, %v5065_v10 }
 0x75d   :  { %5073 = vsyncpa [#allocation5], 1 }
 0x75e   :  { %5074 = vsyncpa [#allocation7], 1 }

</bundles_post_ra>
